<compile_context>
chip_gen: v5e
topology: v5e:2x2
jax: 0.10.0
libtpu: 0.0.40
codegen_flags: <defaults>
</compile_context>

<pallas_src>
import functools
import math

import jax
import jax.numpy as jnp
from jax import lax
from jax.experimental import pallas as pl
from jax.experimental.pallas import tpu as pltpu

NEG_SLOPE = 0.01  # nn.LeakyReLU default
LANE = 128


def _leaky_relu(x):
    # Valid for 0 < slope < 1: max(x, s*x) == x for x>=0, s*x for x<0.
    return jnp.maximum(x, NEG_SLOPE * x)


def _round_up(n, m):
    return ((n + m - 1) // m) * m


# --------------------------------- kernel ----------------------------------

def fused_kernel(x_ref, w_in_ref, b_in_ref, *rest,
                 group_widths, group_repeats, sig_ranges):
    """All four branches, fused.

    rest = [w_hid_g0, b_hid_g0, ..., w_hid_g{ng-1}, b_hid_g{ng-1},
            w_out_all, b_out_all, o_ref]
    Zero-padded weight/bias columns keep padded activation lanes at exactly 0
    through LeakyReLU, so real output columns are unchanged.
    """
    ng = len(group_repeats)
    w_out_ref = rest[2 * ng]
    b_out_ref = rest[2 * ng + 1]
    o_ref = rest[2 * ng + 2]

    # Fused input layer for ALL branches: (TB, Din) @ (Din, sum_hid) on the MXU.
    h_all = jnp.dot(x_ref[...].astype(jnp.bfloat16), w_in_ref[...],
                    preferred_element_type=jnp.float32) + b_in_ref[...]
    h_all = _leaky_relu(h_all)

    # Per repeat-count group: one block-diagonal hidden matmul per repeat.
    segs = []
    off = 0
    for g in range(ng):
        gw = group_widths[g]
        h = h_all[:, off:off + gw]
        off += gw
        w_hid = rest[2 * g][...]      # bf16, hoisted out of the repeat loop
        b_hid = rest[2 * g + 1][...]  # f32
        for _ in range(group_repeats[g]):
            h = _leaky_relu(
                jnp.dot(h.astype(jnp.bfloat16), w_hid,
                        preferred_element_type=jnp.float32) + b_hid)
        segs.append(h)
    h_cat = segs[0] if ng == 1 else jnp.concatenate(segs, axis=1)

    # One block-diagonal output matmul producing the full (TB, nb*out_pad) slab.
    # w_out/b_out are read only here (after the hidden loops).
    out = jnp.dot(h_cat.astype(jnp.bfloat16), w_out_ref[...],
                  preferred_element_type=jnp.float32) + b_out_ref[...]

    if sig_ranges:
        col = lax.broadcasted_iota(jnp.int32, out.shape, 1)
        mask = None
        for s, e in sig_ranges:
            m = (col >= s) & (col < e)
            mask = m if mask is None else (mask | m)
        z = jnp.where(mask, out, 0.0)  # keep exp input bounded off-mask
        sig = pl.reciprocal(1.0 + jnp.exp(-z), approx=True)
        out = jnp.where(mask, sig, out)

    # Single full-width, lane-aligned, unmasked store.
    o_ref[...] = out.astype(o_ref.dtype)


# --------------------------- parameter packing -----------------------------

def pack_radio_emulator_params(branch_params, nlayers, final_sigmoids,
                               lane=LANE):
    """One-time packing: lane padding, branch grouping, block-diag fusion.

    Returns (arrays, meta) where `arrays` are the kernel weight/bias inputs.
    """
    nb = len(branch_params)
    input_len = branch_params[0][0].shape[0]
    input_pad = _round_up(input_len, 8)
    hid = [p[0].shape[1] for p in branch_params]
    out_len = [p[4].shape[1] for p in branch_params]
    hid_pad = [_round_up(h, lane) for h in hid]
    out_pad = _round_up(max(out_len), lane)
    n_rep = [nl - 2 for nl in nlayers]

    # Group branches by repeat count (order of first occurrence preserved).
    groups = []  # [repeat_count, [branch indices]]
    for i in range(nb):
        for g in groups:
            if g[0] == n_rep[i]:
                g[1].append(i)
                break
        else:
            groups.append([n_rep[i], [i]])
    order = [i for _, mem in groups for i in mem]

    hid_off = {}
    off = 0
    for i in order:
        hid_off[i] = off
        off += hid_pad[i]
    sum_hid = off
    out_off = {i: slot * out_pad for slot, i in enumerate(order)}
    total_out = nb * out_pad

    bf16, f32 = jnp.bfloat16, jnp.float32

    def pad_cols(a, width):
        return jnp.pad(a, ((0, 0), (0, width - a.shape[1])))

    # Fused input layer (columns in group/slab order, rows padded to 8).
    w_in_all = jnp.concatenate(
        [jnp.pad(branch_params[i][0],
                 ((0, input_pad - input_len), (0, hid_pad[i] - hid[i])))
         for i in order], axis=1).astype(bf16)
    b_in_all = jnp.concatenate(
        [pad_cols(branch_params[i][1], hid_pad[i]) for i in order],
        axis=1).astype(f32)

    arrays = [w_in_all, b_in_all]
    group_widths, group_repeats = [], []
    for rep, mem in groups:
        gw = sum(hid_pad[i] for i in mem)
        wblk = jnp.zeros((gw, gw), f32)
        roff = 0
        for i in mem:
            wblk = wblk.at[roff:roff + hid[i],
                           roff:roff + hid[i]].set(branch_params[i][2])
            roff += hid_pad[i]
        bblk = jnp.concatenate(
            [pad_cols(branch_params[i][3], hid_pad[i]) for i in mem], axis=1)
        arrays.append(wblk.astype(bf16))
        arrays.append(bblk.astype(f32))
        group_widths.append(gw)
        group_repeats.append(rep)

    # Block-diagonal fused output layer for all branches.
    w_out_all = jnp.zeros((sum_hid, total_out), f32)
    b_out_all = jnp.zeros((1, total_out), f32)
    for i in range(nb):
        w_out_all = w_out_all.at[hid_off[i]:hid_off[i] + hid[i],
                                 out_off[i]:out_off[i] + out_len[i]].set(
                                     branch_params[i][4])
        b_out_all = b_out_all.at[:, out_off[i]:out_off[i] + out_len[i]].set(
            branch_params[i][5])
    arrays.append(w_out_all.astype(bf16))
    arrays.append(b_out_all.astype(f32))

    sig_ranges = tuple((out_off[i], out_off[i] + out_pad)
                       for i in range(nb) if final_sigmoids[i])

    meta = dict(
        nb=nb,
        input_len=input_len,
        input_pad=input_pad,
        out_len=tuple(out_len),
        out_off=tuple(out_off[i] for i in range(nb)),
        out_pad=out_pad,
        total_out=total_out,
        sum_hid=sum_hid,
        group_widths=tuple(group_widths),
        group_repeats=tuple(group_repeats),
        sig_ranges=sig_ranges,
    )
    return tuple(arrays), meta


# -------------------------------- forward ----------------------------------

def radio_emulator_forward(x, arrays, meta):
    """Fused forward pass: one pallas_call, batch-tiled grid."""
    batch, input_len = x.shape
    assert input_len == meta["input_len"]
    nb = meta["nb"]
    total_out = meta["total_out"]
    input_pad = meta["input_pad"]

    # Batch tile: up to 256 rows per grid step (row dim of the MXU is nearly
    # free up to ~256; tiling also bounds per-step VMEM on v5e / v7x).
    TB = min(256, _round_up(max(batch, 1), 8))
    batch_pad = _round_up(batch, TB)
    xp = x
    if batch_pad != batch or input_pad != input_len:
        xp = jnp.pad(x, ((0, batch_pad - batch), (0, input_pad - input_len)))
    grid = (batch_pad // TB,)

    kernel = functools.partial(
        fused_kernel,
        group_widths=meta["group_widths"],
        group_repeats=meta["group_repeats"],
        sig_ranges=meta["sig_ranges"])

    # x and the output are tiled along batch; every weight/bias gets a constant
    # index_map so it stays VMEM-resident across grid steps.
    in_specs = [pl.BlockSpec((TB, input_pad), lambda i: (i, 0))]
    in_specs += [pl.BlockSpec(a.shape, lambda i: (0, 0)) for a in arrays]
    out_specs = pl.BlockSpec((TB, total_out), lambda i: (i, 0))

    # Advisory scheduler hint for XLA around the fused custom call.
    flops = 2 * batch_pad * (
        input_pad * meta["sum_hid"]
        + sum(r * w * w for r, w in zip(meta["group_repeats"],
                                        meta["group_widths"]))
        + meta["sum_hid"] * total_out)
    bytes_accessed = (sum(int(a.size) * a.dtype.itemsize for a in arrays)
                      + batch_pad * (input_pad + total_out) * 4)
    transcendentals = batch_pad * total_out if meta["sig_ranges"] else 0

    out_padded = pl.pallas_call(
        kernel,
        grid=grid,
        in_specs=in_specs,
        out_specs=out_specs,
        out_shape=jax.ShapeDtypeStruct((batch_pad, total_out), jnp.float32),
        compiler_params=pltpu.CompilerParams(
            dimension_semantics=("parallel",)),
        cost_estimate=pl.CostEstimate(flops=int(flops),
                                      transcendentals=int(transcendentals),
                                      bytes_accessed=int(bytes_accessed)),
    )(xp, *arrays)

    # Strip batch + lane padding; concatenate in the original PyTorch order
    # (Tb, Tr, xHI, tau), torch.cat dim=1.
    preds = [out_padded[:batch,
                        meta["out_off"][i]:meta["out_off"][i] + meta["out_len"][i]]
             for i in range(nb)]
    return jnp.concatenate(preds, axis=1)


# ----------------------------- reference path ------------------------------

def _leaky_ref(x):
    return jnp.where(x >= 0, x, NEG_SLOPE * x)


def branch_ref(x, params, *, n_repeats, final_sigmoid):
    w_in, b_in, w_hid, b_hid, w_out, b_out = params
    h = _leaky_ref(x @ w_in + b_in)
    for _ in range(n_repeats):           # shared weights, matching the spec
        h = _leaky_ref(h @ w_hid + b_hid)
    out = h @ w_out + b_out
    if final_sigmoid:
        out = jax.nn.sigmoid(out)
    return out


def radio_emulator_forward_ref(x, branch_params, nlayers, final_sigmoids):
    preds = [branch_ref(x, p, n_repeats=nl - 2, final_sigmoid=sig)
             for p, nl, sig in zip(branch_params, nlayers, final_sigmoids)]
    return jnp.concatenate(preds, axis=1)


# ------------------------------- init helpers ------------------------------

def kaiming_uniform(key, fan_in, fan_out):
    # torch.nn.init.kaiming_uniform_ (a=0): bound = sqrt(6/fan_in)
    bound = math.sqrt(6.0 / fan_in)
    return jax.random.uniform(key, (fan_in, fan_out), jnp.float32, -bound, bound)


def bias_uniform(key, n):
    # torch.nn.init.uniform_(bias, -4.0, -1.0)
    return jax.random.uniform(key, (1, n), jnp.float32, -4.0, -1.0)


def make_branch_params(key, input_len, hidden, out_len):
    k = jax.random.split(key, 6)
    return (kaiming_uniform(k[0], input_len, hidden), bias_uniform(k[1], hidden),
            kaiming_uniform(k[2], hidden, hidden), bias_uniform(k[3], hidden),
            kaiming_uniform(k[4], hidden, out_len), bias_uniform(k[5], out_len))


# ----------------------------------- demo -----------------------------------

if __name__ == "__main__":
    # Small but structurally faithful configuration:
    #   4 branches (Tb, Tr, xHI, tau); xHI ends with Sigmoid; outputs concat dim 1.
    input_len = 5
    nlayers = [4, 4, 3, 3]           # hidden-block repeats = nlayers[i] - 2
    nnodes = [128, 96, 64, 32]       # per-branch hidden widths (shrunk from defaults)
    out_len = [101, 101, 101, 1]
    final_sigmoids = [False, False, True, False]
    batch = 8

    key = jax.random.PRNGKey(0)
    key_x, key_p = jax.random.split(key)
    x = jax.random.normal(key_x, (batch, input_len), dtype=jnp.float32)

    branch_keys = jax.random.split(key_p, 4)
    branch_params = [
        make_branch_params(branch_keys[i], input_len, nnodes[i], out_len[i])
        for i in range(4)
    ]

    # Pack (pad / group / block-diag fuse) ONCE, outside the forward pass.
    arrays, meta = pack_radio_emulator_params(branch_params, nlayers,
                                              final_sigmoids)

    out = radio_emulator_forward(x, arrays, meta)
    out = jax.block_until_ready(out)

    ref = radio_emulator_forward_ref(x, branch_params, nlayers, final_sigmoids)
    ref = jax.block_until_ready(ref)

    assert out.shape == (batch, sum(out_len)), out.shape
    # bf16 MXU operands + f32 accumulation over <=4 matmuls stays well inside
    # this tolerance against the pure-f32 reference.
    assert jnp.allclose(out, ref, rtol=1e-2, atol=1e-2), "mismatch vs JAX reference"

    print("KERNEL_OK")
</pallas_src>

<mosaic_0001>
module attributes {stable_mosaic.version = 11 : i64} {
  func.func @fused_kernel(%arg0: i32, %arg1: memref<8x8xf32, #tpu.memory_space<vmem>>, %arg2: memref<8x512xbf16, #tpu.memory_space<vmem>>, %arg3: memref<1x512xf32, #tpu.memory_space<vmem>>, %arg4: memref<256x256xbf16, #tpu.memory_space<vmem>>, %arg5: memref<1x256xf32, #tpu.memory_space<vmem>>, %arg6: memref<256x256xbf16, #tpu.memory_space<vmem>>, %arg7: memref<1x256xf32, #tpu.memory_space<vmem>>, %arg8: memref<512x512xbf16, #tpu.memory_space<vmem>>, %arg9: memref<1x512xf32, #tpu.memory_space<vmem>>, %arg10: memref<8x512xf32, #tpu.memory_space<vmem>>) attributes {dimension_semantics = [#tpu.dimension_semantics<parallel>], iteration_bounds = array<i64: 1>, scalar_prefetch = 0 : i64, scratch_operands = 0 : i64, tpu.core_type = #tpu.core_type<tc>, window_params = [{transform_indices = @transform_0, window_bounds = array<i64: 8, 8>}, {pipeline_mode = #tpu.pipeline_mode<synchronous>, transform_indices = @transform_1, window_bounds = array<i64: 8, 512>}, {pipeline_mode = #tpu.pipeline_mode<synchronous>, transform_indices = @transform_2, window_bounds = array<i64: 1, 512>}, {pipeline_mode = #tpu.pipeline_mode<synchronous>, transform_indices = @transform_3, window_bounds = array<i64: 256, 256>}, {pipeline_mode = #tpu.pipeline_mode<synchronous>, transform_indices = @transform_4, window_bounds = array<i64: 1, 256>}, {pipeline_mode = #tpu.pipeline_mode<synchronous>, transform_indices = @transform_5, window_bounds = array<i64: 256, 256>}, {pipeline_mode = #tpu.pipeline_mode<synchronous>, transform_indices = @transform_6, window_bounds = array<i64: 1, 256>}, {pipeline_mode = #tpu.pipeline_mode<synchronous>, transform_indices = @transform_7, window_bounds = array<i64: 512, 512>}, {pipeline_mode = #tpu.pipeline_mode<synchronous>, transform_indices = @transform_8, window_bounds = array<i64: 1, 512>}, {transform_indices = @transform_9, window_bounds = array<i64: 8, 512>}]} {
    %c0 = arith.constant 0 : index
    %c0_0 = arith.constant 0 : index
    %0 = vector.load %arg1[%c0, %c0_0] : memref<8x8xf32, #tpu.memory_space<vmem>>, vector<8x8xf32>
    %1 = arith.truncf %0 : vector<8x8xf32> to vector<8x8xbf16>
    %c0_1 = arith.constant 0 : index
    %c0_2 = arith.constant 0 : index
    %2 = vector.load %arg2[%c0_1, %c0_2] : memref<8x512xbf16, #tpu.memory_space<vmem>>, vector<8x512xbf16>
    %cst = arith.constant dense<0.000000e+00> : vector<8x512xf32>
    %3 = tpu.matmul %1, %2, %cst {dimension_numbers = #tpu.dot_dimension_numbers<[1], [0], [0], [1], [0, 0, 1, 1], [], []>} : vector<8x8xbf16>, vector<8x512xbf16>, vector<8x512xf32> -> vector<8x512xf32>
    %c0_3 = arith.constant 0 : index
    %c0_4 = arith.constant 0 : index
    %4 = vector.load %arg3[%c0_3, %c0_4] : memref<1x512xf32, #tpu.memory_space<vmem>>, vector<1x512xf32>
    %5 = vector.broadcast %4 : vector<1x512xf32> to vector<8x512xf32>
    %6 = arith.addf %3, %5 : vector<8x512xf32>
    %cst_5 = arith.constant 0.00999999977 : f32
    %7 = vector.broadcast %cst_5 : f32 to vector<8x512xf32>
    %8 = arith.mulf %7, %6 : vector<8x512xf32>
    %9 = arith.maximumf %6, %8 : vector<8x512xf32>
    %10 = vector.extract_strided_slice %9 {offsets = [0, 0], sizes = [8, 256], strides = [1, 1]} : vector<8x512xf32> to vector<8x256xf32>
    %c0_6 = arith.constant 0 : index
    %c0_7 = arith.constant 0 : index
    %11 = vector.load %arg4[%c0_6, %c0_7] : memref<256x256xbf16, #tpu.memory_space<vmem>>, vector<256x256xbf16>
    %c0_8 = arith.constant 0 : index
    %c0_9 = arith.constant 0 : index
    %12 = vector.load %arg5[%c0_8, %c0_9] : memref<1x256xf32, #tpu.memory_space<vmem>>, vector<1x256xf32>
    %13 = arith.truncf %10 : vector<8x256xf32> to vector<8x256xbf16>
    %cst_10 = arith.constant dense<0.000000e+00> : vector<8x256xf32>
    %14 = tpu.matmul %13, %11, %cst_10 {dimension_numbers = #tpu.dot_dimension_numbers<[1], [0], [0], [1], [0, 0, 1, 1], [], []>} : vector<8x256xbf16>, vector<256x256xbf16>, vector<8x256xf32> -> vector<8x256xf32>
    %15 = vector.broadcast %12 : vector<1x256xf32> to vector<8x256xf32>
    %16 = arith.addf %14, %15 : vector<8x256xf32>
    %cst_11 = arith.constant 0.00999999977 : f32
    %17 = vector.broadcast %cst_11 : f32 to vector<8x256xf32>
    %18 = arith.mulf %17, %16 : vector<8x256xf32>
    %19 = arith.maximumf %16, %18 : vector<8x256xf32>
    %20 = arith.truncf %19 : vector<8x256xf32> to vector<8x256xbf16>
    %cst_12 = arith.constant dense<0.000000e+00> : vector<8x256xf32>
    %21 = tpu.matmul %20, %11, %cst_12 {dimension_numbers = #tpu.dot_dimension_numbers<[1], [0], [0], [1], [0, 0, 1, 1], [], []>} : vector<8x256xbf16>, vector<256x256xbf16>, vector<8x256xf32> -> vector<8x256xf32>
    %22 = vector.broadcast %12 : vector<1x256xf32> to vector<8x256xf32>
    %23 = arith.addf %21, %22 : vector<8x256xf32>
    %cst_13 = arith.constant 0.00999999977 : f32
    %24 = vector.broadcast %cst_13 : f32 to vector<8x256xf32>
    %25 = arith.mulf %24, %23 : vector<8x256xf32>
    %26 = arith.maximumf %23, %25 : vector<8x256xf32>
    %27 = vector.extract_strided_slice %9 {offsets = [0, 256], sizes = [8, 256], strides = [1, 1]} : vector<8x512xf32> to vector<8x256xf32>
    %c0_14 = arith.constant 0 : index
    %c0_15 = arith.constant 0 : index
    %28 = vector.load %arg6[%c0_14, %c0_15] : memref<256x256xbf16, #tpu.memory_space<vmem>>, vector<256x256xbf16>
    %c0_16 = arith.constant 0 : index
    %c0_17 = arith.constant 0 : index
    %29 = vector.load %arg7[%c0_16, %c0_17] : memref<1x256xf32, #tpu.memory_space<vmem>>, vector<1x256xf32>
    %30 = arith.truncf %27 : vector<8x256xf32> to vector<8x256xbf16>
    %cst_18 = arith.constant dense<0.000000e+00> : vector<8x256xf32>
    %31 = tpu.matmul %30, %28, %cst_18 {dimension_numbers = #tpu.dot_dimension_numbers<[1], [0], [0], [1], [0, 0, 1, 1], [], []>} : vector<8x256xbf16>, vector<256x256xbf16>, vector<8x256xf32> -> vector<8x256xf32>
    %32 = vector.broadcast %29 : vector<1x256xf32> to vector<8x256xf32>
    %33 = arith.addf %31, %32 : vector<8x256xf32>
    %cst_19 = arith.constant 0.00999999977 : f32
    %34 = vector.broadcast %cst_19 : f32 to vector<8x256xf32>
    %35 = arith.mulf %34, %33 : vector<8x256xf32>
    %36 = arith.maximumf %33, %35 : vector<8x256xf32>
    %37 = tpu.concatenate %26, %36 in 1 : vector<8x256xf32>, vector<8x256xf32> -> vector<8x512xf32>
    %38 = arith.truncf %37 : vector<8x512xf32> to vector<8x512xbf16>
    %c0_20 = arith.constant 0 : index
    %c0_21 = arith.constant 0 : index
    %39 = vector.load %arg8[%c0_20, %c0_21] : memref<512x512xbf16, #tpu.memory_space<vmem>>, vector<512x512xbf16>
    %cst_22 = arith.constant dense<0.000000e+00> : vector<8x512xf32>
    %40 = tpu.matmul %38, %39, %cst_22 {dimension_numbers = #tpu.dot_dimension_numbers<[1], [0], [0], [1], [0, 0, 1, 1], [], []>} : vector<8x512xbf16>, vector<512x512xbf16>, vector<8x512xf32> -> vector<8x512xf32>
    %c0_23 = arith.constant 0 : index
    %c0_24 = arith.constant 0 : index
    %41 = vector.load %arg9[%c0_23, %c0_24] : memref<1x512xf32, #tpu.memory_space<vmem>>, vector<1x512xf32>
    %42 = vector.broadcast %41 : vector<1x512xf32> to vector<8x512xf32>
    %43 = arith.addf %40, %42 : vector<8x512xf32>
    %44 = tpu.iota {dimensions = array<i32: 1>} : vector<8x512xi32>
    %c256_i32 = arith.constant 256 : i32
    %45 = vector.broadcast %c256_i32 : i32 to vector<8x512xi32>
    %46 = arith.cmpi sge, %44, %45 : vector<8x512xi32>
    %c384_i32 = arith.constant 384 : i32
    %47 = vector.broadcast %c384_i32 : i32 to vector<8x512xi32>
    %48 = arith.cmpi slt, %44, %47 : vector<8x512xi32>
    %49 = arith.andi %46, %48 : vector<8x512xi1>
    %cst_25 = arith.constant 0.000000e+00 : f32
    %50 = vector.broadcast %cst_25 : f32 to vector<8x512xf32>
    %51 = arith.select %49, %43, %50 : vector<8x512xi1>, vector<8x512xf32>
    %cst_26 = arith.constant 0.000000e+00 : f32
    %52 = vector.broadcast %cst_26 : f32 to vector<8x512xf32>
    %53 = arith.subf %52, %51 : vector<8x512xf32>
    %54 = math.exp %53 : vector<8x512xf32>
    %cst_27 = arith.constant 1.000000e+00 : f32
    %55 = vector.broadcast %cst_27 : f32 to vector<8x512xf32>
    %56 = arith.addf %55, %54 : vector<8x512xf32>
    %57 = tpu.reciprocal %56 {approx = true} : vector<8x512xf32> -> vector<8x512xf32>
    %58 = arith.select %49, %57, %43 : vector<8x512xi1>, vector<8x512xf32>
    %c0_28 = arith.constant 0 : index
    %c0_29 = arith.constant 0 : index
    %59 = vector.load %arg10[%c0_28, %c0_29] : memref<8x512xf32, #tpu.memory_space<vmem>>, vector<8x512xf32>
    tpu.vector_store %arg10[%c0_28, %c0_29], %58 {strides = array<i32>} : memref<8x512xf32, #tpu.memory_space<vmem>>, vector<8x512xf32>,
    return
  }
  func.func @transform_0(%arg0: i32) -> (i32, i32) {
    %c0_i32 = arith.constant 0 : i32
    %c0_i32_0 = arith.constant 0 : i32
    return %arg0, %c0_i32 : i32, i32
  }
  func.func @transform_1(%arg0: i32) -> (i32, i32) {
    %c0_i32 = arith.constant 0 : i32
    %c0_i32_0 = arith.constant 0 : i32
    %c0_i32_1 = arith.constant 0 : i32
    return %c0_i32, %c0_i32_0 : i32, i32
  }
  func.func @transform_2(%arg0: i32) -> (i32, i32) {
    %c0_i32 = arith.constant 0 : i32
    %c0_i32_0 = arith.constant 0 : i32
    %c0_i32_1 = arith.constant 0 : i32
    return %c0_i32, %c0_i32_0 : i32, i32
  }
  func.func @transform_3(%arg0: i32) -> (i32, i32) {
    %c0_i32 = arith.constant 0 : i32
    %c0_i32_0 = arith.constant 0 : i32
    %c0_i32_1 = arith.constant 0 : i32
    return %c0_i32, %c0_i32_0 : i32, i32
  }
  func.func @transform_4(%arg0: i32) -> (i32, i32) {
    %c0_i32 = arith.constant 0 : i32
    %c0_i32_0 = arith.constant 0 : i32
    %c0_i32_1 = arith.constant 0 : i32
    return %c0_i32, %c0_i32_0 : i32, i32
  }
  func.func @transform_5(%arg0: i32) -> (i32, i32) {
    %c0_i32 = arith.constant 0 : i32
    %c0_i32_0 = arith.constant 0 : i32
    %c0_i32_1 = arith.constant 0 : i32
    return %c0_i32, %c0_i32_0 : i32, i32
  }
  func.func @transform_6(%arg0: i32) -> (i32, i32) {
    %c0_i32 = arith.constant 0 : i32
    %c0_i32_0 = arith.constant 0 : i32
    %c0_i32_1 = arith.constant 0 : i32
    return %c0_i32, %c0_i32_0 : i32, i32
  }
  func.func @transform_7(%arg0: i32) -> (i32, i32) {
    %c0_i32 = arith.constant 0 : i32
    %c0_i32_0 = arith.constant 0 : i32
    %c0_i32_1 = arith.constant 0 : i32
    return %c0_i32, %c0_i32_0 : i32, i32
  }
  func.func @transform_8(%arg0: i32) -> (i32, i32) {
    %c0_i32 = arith.constant 0 : i32
    %c0_i32_0 = arith.constant 0 : i32
    %c0_i32_1 = arith.constant 0 : i32
    return %c0_i32, %c0_i32_0 : i32, i32
  }
  func.func @transform_9(%arg0: i32) -> (i32, i32) {
    %c0_i32 = arith.constant 0 : i32
    %c0_i32_0 = arith.constant 0 : i32
    return %arg0, %c0_i32 : i32, i32
  }
}

</mosaic_0001>

<bundles_post_ra>
// kernel: tpu_custom_call.1
= control target key start
LH: loop header
LB: loop body
LE: loop exit
PB: predicated region body
PF: predicated region fallthrough
CT: control target
= control target key end

     0   :  { %14 = vsyncpa [#allocation3], 0  ;;  %s3285_s0 = inlined_call_operand.hbm [shape: f32[8,8], index: 0, kind: input, shape index: {}]   ;;  %s3286_s1 = inlined_call_operand.hbm [shape: bf16[8,512], index: 1, kind: input, shape index: {}]   ;;  %s3287_s2 = inlined_call_operand.hbm [shape: f32[1,512], index: 2, kind: input, shape index: {}]   ;;  %s3288_s3 = inlined_call_operand.hbm [shape: bf16[256,256], index: 3, kind: input, shape index: {}]   ;;  %s3289_s4 = inlined_call_operand.vmem [shape: f32[1,256], index: 4, kind: input, shape index: {}]   ;;  %s3290_s5 = inlined_call_operand.hbm [shape: bf16[256,256], index: 5, kind: input, shape index: {}]   ;;  %s3291_s6 = inlined_call_operand.hbm [shape: f32[1,256], index: 6, kind: input, shape index: {}]   ;;  %s3292_s7 = inlined_call_operand.hbm [shape: bf16[512,512], index: 7, kind: input, shape index: {}]   ;;  %s3293_s8 = inlined_call_operand.vmem [shape: f32[1,512], index: 8, kind: input, shape index: {}]   ;;  %s3294_s9 = inlined_call_operand.hbm [shape: f32[8,512], index: 9, kind: output, shape index: {}]  }
   0x1   :  { %15 = vsyncpa [#allocation6], 0 }
   0x2   :  { %16 = vsyncpa [#allocation9], 0 }
   0x3   :  { %17 = vsyncpa [#allocation12], 0  ;;  %s35_s11 = sshll.u32 %s3286_s1, 4  ;;  %s36_s11 = int_to_ptr.hbm [resolvable:$true] %s35_s11 }
   0x4   :  { %18 = vsyncpa [#allocation4], 0  ;;  %s3047_s12 = smov [#allocation5]   ;;  %s56_s16 = sshll.u32 %s3288_s3, 4  ;;  %s57_s16 = int_to_ptr.hbm [resolvable:$true] %s56_s16 }
   0x5   :  { %s37_s13 = sshll.u32 %s3047_s12, 4  ;;  %s3048_s17 = smov [#allocation8]   ;;  %s38_s13 = int_to_ptr.vmem [resolvable:$true] %s37_s13 }
   0x6   :  { %40 = dma.hbm_to_vmem [thread:$0]  %s36_s11, 256, %s38_s13, [#allocation6]  }
   0x7   :  { %s58_s18 = sshll.u32 %s3048_s17, 4  ;;  %s3049_s19 = smov 128   ;;  %s59_s18 = int_to_ptr.vmem [resolvable:$true] %s58_s18 }
   0x8   :  { %s3050_s20 = smov 8   ;;  %s85_s22 = sshll.u32 %s3291_s6, 4  ;;  %s86_s22 = int_to_ptr.hbm [resolvable:$true] %s85_s22 }
   0x9   :  { %64 = dma.hbm_to_vmem [thread:$0]  %s57_s16, 4096, %s59_s18, [#allocation9], %s3049_s19, %s3049_s19, %s3050_s20  }
   0xa   :  { %s3051_s23 = smov [#allocation11]   ;;  %s24_s26 = sshll.u32 %s3285_s0, 4  ;;  %s25_s26 = int_to_ptr.hbm [resolvable:$true] %s24_s26 }
   0xb   :  { %s87_s24 = sshll.u32 %s3051_s23, 4  ;;  %s3052_s27 = smov [#allocation2]   ;;  %s88_s24 = int_to_ptr.vmem [resolvable:$true] %s87_s24 }
   0xc   :  { %90 = dma.hbm_to_vmem [thread:$0]  %s86_s22, 32, %s88_s24, [#allocation12]  }
   0xd   :  { %s26_s28 = sshll.u32 %s3052_s27, 4  ;;  %s46_s10 = sshll.u32 %s3287_s2, 4  ;;  %s27_s28 = int_to_ptr.vmem [resolvable:$true] %s26_s28  ;;  %s47_s10 = int_to_ptr.hbm [resolvable:$true] %s46_s10 }
   0xe   :  { %29 = dma.hbm_to_vmem [thread:$0]  %s25_s26, 128, %s27_s28, [#allocation3]  }
   0xf   :  { %s71_s12 = sshll.u32 %s3290_s5, 4  ;;  %s3053_s13 = smov [#allocation7]   ;;  %s72_s12 = int_to_ptr.hbm [resolvable:$true] %s71_s12 }
  0x10   :  { %s48_s14 = sshll.u32 %s3053_s13, 4  ;;  %s3054_s0 = smov [#allocation10]   ;;  %s49_s14 = int_to_ptr.vmem [resolvable:$true] %s48_s14 }
  0x11   :  { %51 = dma.hbm_to_vmem [thread:$0]  %s47_s10, 64, %s49_s14, [#allocation6]  }
  0x12   :  { %s73_s15 = sshll.u32 %s3054_s0, 4  ;;  %s95_s18 = sshll.u32 %s3292_s7, 4  ;;  %s74_s15 = int_to_ptr.vmem [resolvable:$true] %s73_s15  ;;  %s96_s18 = int_to_ptr.hbm [resolvable:$true] %s95_s18 }
  0x13   :  { %79 = dma.hbm_to_vmem [thread:$0]  %s72_s12, 4096, %s74_s15, [#allocation9], %s3049_s19, %s3049_s19, %s3050_s20  }
  0x14   :  { %s3055_s2 = smov [#allocation13]   ;;  %s3056_s5 = smov 256  }
  0x15   :  { %s97_s1 = sshll.u32 %s3055_s2, 4  ;;  %s3057_s21 = smov 16   ;;  %s98_s1 = int_to_ptr.vmem [resolvable:$true] %s97_s1 }
  0x16   :  { %103 = dma.hbm_to_vmem [thread:$0]  %s96_s18, 16384, %s98_s1, [#allocation12], %s3056_s5, %s3056_s5, %s3057_s21  }
  0x17   :  { %3037 = dma.done.wait [#allocation3], 128  }
  0x18   :  { %3038 = vsyncadd [#allocation3], 4294967168 }
  0x19   :  { %3039 = dma.done.wait [#allocation6], 320  }
  0x1a   :  { %3040 = vsyncadd [#allocation6], 4294966976 }
  0x1b   :  { %3041 = dma.done.wait [#allocation9], 8192  }
  0x1c   :  { %3042 = vsyncadd [#allocation9], 4294959104 }
  0x1d   :  { %3043 = dma.done.wait [#allocation12], 16416  }
  0x1e   :  { %3044 = vsyncadd [#allocation12], 4294950880  ;;  %v137_v0 = vld [vmem:[#allocation5] sm:$0xff]  ;;  %v138_v1 = vld [vmem:[#allocation5 + $0x8] sm:$0xff]  ;;  %vm163_vm0 = vcmask 1043456   ;;  %vm159_vm1 = vcmask 64512  }
  0x1f   :  { %v151_v2 = vunpack.c.l.b16 %v137_v0  ;;  %v152_v3 = vunpack.c.h.b16 %v137_v0  ;;  %v153_v4 = vunpack.c.l.b16 %v138_v1  ;;  %v1927_v5 = vld [vmem:[#allocation8 + $0x70] sm:$0xf]  ;;  %v2652_v6 = vld [vmem:[#allocation8 + $0x74] sm:$0xf0]  ;;  %v135_v8 = vld [vmem:[#allocation2] sm:$0xff]  ;;  %v154_v9 = vunpack.c.h.b16 %v138_v1  ;;  %s1852_s3 = sshll.u32 %s3294_s9, 4  ;;  %s1853_s3 = int_to_ptr.hbm [resolvable:$true] %s1852_s3 }
  0x20   :  { %v1991_v7 = vld [vmem:[#allocation8 + $0xf0] sm:$0xf]  ;;  %v2668_v10 = vld [vmem:[#allocation8 + $0xf4] sm:$0xf0]  ;;  %v2651_v11 = vld [vmem:[#allocation8 + $0x74] sm:$0xf]  ;;  %v3136_v19 = vor.u32 %v2652_v6, %v1927_v5  ;;  %v136_v26 = vpack.c.bf16 %v135_v8, %v135_v8 }
  0x21   :  { %v155_v12 = vpack.c.b16 %v151_v2, %v151_v2  ;;  %v156_v13 = vpack.c.b16 %v152_v3, %v152_v3  ;;  %v157_v14 = vpack.c.b16 %v153_v4, %v153_v4  ;;  %v1929_v15 = vld [vmem:[#allocation8 + $0x78] sm:$0xf0]  ;;  %v2667_v16 = vld [vmem:[#allocation8 + $0xf4] sm:$0xf]  ;;  %v158_v18 = vpack.c.b16 %v154_v9, %v154_v9  ;;  %v1919_v21 = vld [vmem:[#allocation8 + $0x60] sm:$0xf] }
  0x22   :  { %v1993_v17 = vld [vmem:[#allocation8 + $0xf8] sm:$0xf0]  ;;  %v3138_v20 = vor.u32 %v2668_v10, %v1991_v7  ;;  %v2650_v22 = vld [vmem:[#allocation8 + $0x64] sm:$0xf0]  ;;  %v1983_v23 = vld [vmem:[#allocation8 + $0xe0] sm:$0xf]  ;;  %v3144_v30 = vor.u32 %v2651_v11, %v1929_v15 }
  0x23   :  { %v165_v24 = vsel %vm163_vm0, %v155_v12, 0  ;;  %v168_v25 = vsel %vm163_vm0, %v156_v13, 0  ;;  %v171_v27 = vsel %vm163_vm0, %v157_v14, 0  ;;  %v2666_v28 = vld [vmem:[#allocation8 + $0xe4] sm:$0xf0]  ;;  %v174_v29 = vsel %vm163_vm0, %v158_v18, 0 }
  0x24   :  { %183 = vmatpush.bf16.msra.mxu0 %v165_v24  ;;  %196 = vmatpush.bf16.msra.mxu1 %v168_v25  ;;  %v3146_v31 = vor.u32 %v2667_v16, %v1993_v17  ;;  %v2649_v32 = vld [vmem:[#allocation8 + $0x64] sm:$0xf]  ;;  %v1921_v33 = vld [vmem:[#allocation8 + $0x68] sm:$0xf0]  ;;  %v3150_v36 = vor.u32 %v2650_v22, %v1919_v21  ;;  %v3152_v37 = vor.u32 %v2666_v28, %v1983_v23  ;;  %v1911_v38 = vld [vmem:[#allocation8 + $0x50] sm:$0xf] }
  0x25   :  { %209 = vmatpush.bf16.msra.mxu2 %v171_v27  ;;  %222 = vmatpush.bf16.msra.mxu3 %v174_v29  ;;  %v2665_v34 = vld [vmem:[#allocation8 + $0xe4] sm:$0xf]  ;;  %v1985_v35 = vld [vmem:[#allocation8 + $0xe8] sm:$0xf0]  ;;  %v2648_v39 = vld [vmem:[#allocation8 + $0x54] sm:$0xf0]  ;;  %v3158_v42 = vor.u32 %v2649_v32, %v1921_v33 }
  0x26   :  { %v1975_v40 = vld [vmem:[#allocation8 + $0xd0] sm:$0xf]  ;;  %v2664_v41 = vld [vmem:[#allocation8 + $0xd4] sm:$0xf0]  ;;  %v3160_v43 = vor.u32 %v2665_v34, %v1985_v35  ;;  %v2647_v44 = vld [vmem:[#allocation8 + $0x54] sm:$0xf]  ;;  %v3166_v48 = vor.u32 %v2648_v39, %v1911_v38 }
  0x27   :  { %1865 = vmatmul.msk.bf16.vlgmr.msra.gmra.mxu0 %vm159_vm1, %v136_v26  ;;  %1866 = vmatmul.msk.bf16.vlgmr.msra.gmra.mxu1 %vm159_vm1, %v136_v26  ;;  %v1913_v45 = vld [vmem:[#allocation8 + $0x58] sm:$0xf0]  ;;  %v2663_v46 = vld [vmem:[#allocation8 + $0xd4] sm:$0xf]  ;;  %v3168_v49 = vor.u32 %v2664_v41, %v1975_v40  ;;  %v1903_v50 = vld [vmem:[#allocation8 + $0x40] sm:$0xf] }
  0x28   :  { %436 = vmatpush.bf16.msrb.mxu0 %v3136_v19  ;;  %449 = vmatpush.bf16.msrb.mxu1 %v3138_v20  ;;  %v1977_v47 = vld [vmem:[#allocation8 + $0xd8] sm:$0xf0]  ;;  %v2646_v51 = vld [vmem:[#allocation8 + $0x44] sm:$0xf0]  ;;  %v1967_v52 = vld [vmem:[#allocation8 + $0xc0] sm:$0xf]  ;;  %v3172_v54 = vor.u32 %v2647_v44, %v1913_v45 }
  0x29   :  { %462 = vmatpush.bf16.msrb.mxu2 %v3144_v30  ;;  %475 = vmatpush.bf16.msrb.mxu3 %v3146_v31  ;;  %v2662_v53 = vld [vmem:[#allocation8 + $0xc4] sm:$0xf0]  ;;  %v3174_v55 = vor.u32 %v2663_v46, %v1977_v47  ;;  %v2645_v56 = vld [vmem:[#allocation8 + $0x44] sm:$0xf]  ;;  %v1905_v57 = vld [vmem:[#allocation8 + $0x48] sm:$0xf0]  ;;  %v3178_v60 = vor.u32 %v2646_v51, %v1903_v50 }
  0x2a   :  { %1867 = vmatmul.msk.bf16.vlgmr.msra.gmra.mxu2 %vm159_vm1, %v136_v26  ;;  %1868 = vmatmul.msk.bf16.vlgmr.msra.gmra.mxu3 %vm159_vm1, %v136_v26  ;;  %v2661_v58 = vld [vmem:[#allocation8 + $0xc4] sm:$0xf]  ;;  %v1969_v59 = vld [vmem:[#allocation8 + $0xc8] sm:$0xf0]  ;;  %v3180_v61 = vor.u32 %v2662_v53, %v1967_v52  ;;  %v1895_v62 = vld [vmem:[#allocation8 + $0x30] sm:$0xf]  ;;  %v3184_v2 = vor.u32 %v2645_v56, %v1905_v57 }
  0x2b   :  { %v2644_v63 = vld [vmem:[#allocation8 + $0x34] sm:$0xf0]  ;;  %v1959_v0 = vld [vmem:[#allocation8 + $0xb0] sm:$0xf]  ;;  %v3186_v3 = vor.u32 %v2661_v58, %v1969_v59  ;;  %v2643_v4 = vld [vmem:[#allocation8 + $0x34] sm:$0xf] }
  0x2c   :  { %437 = vmatpush.bf16.msrb.mxu0 %v3150_v36  ;;  %450 = vmatpush.bf16.msrb.mxu1 %v3152_v37  ;;  %v2660_v1 = vld [vmem:[#allocation8 + $0xb4] sm:$0xf0]  ;;  %v1897_v5 = vld [vmem:[#allocation8 + $0x38] sm:$0xf0]  ;;  %v2659_v6 = vld [vmem:[#allocation8 + $0xb4] sm:$0xf]  ;;  %v3190_v8 = vor.u32 %v2644_v63, %v1895_v62 }
  0x2d   :  { %463 = vmatpush.bf16.msrb.mxu2 %v3158_v42  ;;  %476 = vmatpush.bf16.msrb.mxu3 %v3160_v43  ;;  %v1961_v7 = vld [vmem:[#allocation8 + $0xb8] sm:$0xf0]  ;;  %v3192_v9 = vor.u32 %v2660_v1, %v1959_v0  ;;  %v1887_v10 = vld [vmem:[#allocation8 + $0x20] sm:$0xf]  ;;  %v2642_v11 = vld [vmem:[#allocation8 + $0x24] sm:$0xf0]  ;;  %v3196_v14 = vor.u32 %v2643_v4, %v1897_v5 }
  0x2e   :  { %v1951_v12 = vld [vmem:[#allocation8 + $0xa0] sm:$0xf]  ;;  %v2658_v13 = vld [vmem:[#allocation8 + $0xa4] sm:$0xf0]  ;;  %v3198_v15 = vor.u32 %v2659_v6, %v1961_v7  ;;  %v2641_v16 = vld [vmem:[#allocation8 + $0x24] sm:$0xf]  ;;  %v1888_v22 = vor.u32 %v2642_v11, %v1887_v10 }
  0x2f   :  { %v1889_v17 = vld [vmem:[#allocation8 + $0x28] sm:$0xf0]  ;;  %v2657_v18 = vld [vmem:[#allocation8 + $0xa4] sm:$0xf]  ;;  %v3202_v23 = vor.u32 %v2658_v13, %v1951_v12  ;;  %v1879_v26 = vld [vmem:[#allocation8 + $0x10] sm:$0xf] }
  0x30   :  { %438 = vmatpush.bf16.msrb.mxu0 %v3166_v48  ;;  %451 = vmatpush.bf16.msrb.mxu1 %v3168_v49  ;;  %v1953_v21 = vld [vmem:[#allocation8 + $0xa8] sm:$0xf0]  ;;  %v1892_v24 = vor.u32 %v2641_v16, %v1889_v17  ;;  %v2640_v27 = vld [vmem:[#allocation8 + $0x14] sm:$0xf0]  ;;  %v1943_v29 = vld [vmem:[#allocation8 + $0x90] sm:$0xf] }
  0x31   :  { %464 = vmatpush.bf16.msrb.mxu2 %v3172_v54  ;;  %477 = vmatpush.bf16.msrb.mxu3 %v3174_v55  ;;  %v1956_v25 = vor.u32 %v2657_v18, %v1953_v21  ;;  %v1880_v28 = vor.u32 %v2640_v27, %v1879_v26  ;;  %v2656_v32 = vld [vmem:[#allocation8 + $0x94] sm:$0xf0]  ;;  %v2639_v33 = vld [vmem:[#allocation8 + $0x14] sm:$0xf]  ;;  %v1881_v35 = vld [vmem:[#allocation8 + $0x18] sm:$0xf0] }
  0x32   :  { %v1944_v34 = vor.u32 %v2656_v32, %v1943_v29  ;;  %v2655_v38 = vld [vmem:[#allocation8 + $0x94] sm:$0xf]  ;;  %v1945_v39 = vld [vmem:[#allocation8 + $0x98] sm:$0xf0]  ;;  %v1884_v40 = vor.u32 %v2639_v33, %v1881_v35  ;;  %v1871_v44 = vld [vmem:[#allocation8] sm:$0xf] }
  0x33   :  { %v1948_v41 = vor.u32 %v2655_v38, %v1945_v39  ;;  %v2638_v45 = vld [vmem:[#allocation8 + $0x4] sm:$0xf0]  ;;  %v1935_v46 = vld [vmem:[#allocation8 + $0x80] sm:$0xf]  ;;  %v2637_v51 = vld [vmem:[#allocation8 + $0x4] sm:$0xf] }
  0x34   :  { %439 = vmatpush.bf16.msrb.mxu0 %v3178_v60  ;;  %452 = vmatpush.bf16.msrb.mxu1 %v3180_v61  ;;  %v1872_v47 = vor.u32 %v2638_v45, %v1871_v44  ;;  %v2654_v50 = vld [vmem:[#allocation8 + $0x84] sm:$0xf0]  ;;  %v1873_v52 = vld [vmem:[#allocation8 + $0x8] sm:$0xf0]  ;;  %v2653_v57 = vld [vmem:[#allocation8 + $0x84] sm:$0xf] }
  0x35   :  { %465 = vmatpush.bf16.msrb.mxu2 %v3184_v2  ;;  %478 = vmatpush.bf16.msrb.mxu3 %v3186_v3  ;;  %v1936_v53 = vor.u32 %v2654_v50, %v1935_v46  ;;  %v1876_v56 = vor.u32 %v2637_v51, %v1873_v52  ;;  %v1937_v58 = vld [vmem:[#allocation8 + $0x88] sm:$0xf0]  ;;  %v2682_v10 = vld [vmem:[#allocation10 + $0x64] sm:$0xf0]  ;;  %v2681_v11 = vld [vmem:[#allocation10 + $0x64] sm:$0xf] }
  0x36   :  { %v1940_v59 = vor.u32 %v2653_v57, %v1937_v58  ;;  %v2049_v13 = vld [vmem:[#allocation10 + $0x68] sm:$0xf0]  ;;  %v2700_v16 = vld [vmem:[#allocation10 + $0xf4] sm:$0xf0]  ;;  %v2699_v17 = vld [vmem:[#allocation10 + $0xf4] sm:$0xf] }
  0x37   :  { %v2121_v21 = vld [vmem:[#allocation10 + $0xf8] sm:$0xf0]  ;;  %v2111_v29 = vld [vmem:[#allocation10 + $0xe0] sm:$0xf]  ;;  %v2698_v32 = vld [vmem:[#allocation10 + $0xe4] sm:$0xf0] }
  0x38   :  { %440 = vmatpush.bf16.msrb.mxu0 %v3190_v8  ;;  %453 = vmatpush.bf16.msrb.mxu1 %v3192_v9  ;;  %v2041_v27 = vld [vmem:[#allocation10 + $0x58] sm:$0xf0]  ;;  %v2697_v33 = vld [vmem:[#allocation10 + $0xe4] sm:$0xf]  ;;  %v2113_v35 = vld [vmem:[#allocation10 + $0xe8] sm:$0xf0] }
  0x39   :  { %466 = vmatpush.bf16.msrb.mxu2 %v3196_v14  ;;  %479 = vmatpush.bf16.msrb.mxu3 %v3198_v15  ;;  %v2116_v38 = vor.u32 %v2697_v33, %v2113_v35  ;;  %v2031_v39 = vld [vmem:[#allocation10 + $0x40] sm:$0xf]  ;;  %v2677_v44 = vld [vmem:[#allocation10 + $0x44] sm:$0xf]  ;;  %v2033_v45 = vld [vmem:[#allocation10 + $0x48] sm:$0xf0] }
  0x3a   :  { %v2036_v46 = vor.u32 %v2677_v44, %v2033_v45  ;;  %v2696_v50 = vld [vmem:[#allocation10 + $0xd4] sm:$0xf0]  ;;  %v2695_v51 = vld [vmem:[#allocation10 + $0xd4] sm:$0xf]  ;;  %v2023_v57 = vld [vmem:[#allocation10 + $0x30] sm:$0xf] }
  0x3b   :  { %v2676_v58 = vld [vmem:[#allocation10 + $0x34] sm:$0xf0]  ;;  %v2065_v45 = vld [vmem:[#allocation10 + $0x88] sm:$0xf0] }
  0x3c   :  { %441 = vmatpush.bf16.msrb.mxu0 %v1888_v22  ;;  %454 = vmatpush.bf16.msrb.mxu1 %v3202_v23 }
  0x3d   :  { %467 = vmatpush.bf16.msrb.mxu2 %v1892_v24  ;;  %480 = vmatpush.bf16.msrb.mxu3 %v1956_v25 }
  0x40   :  { %442 = vmatpush.bf16.msrb.mxu0 %v1880_v28  ;;  %455 = vmatpush.bf16.msrb.mxu1 %v1944_v34 }
  0x41   :  { %468 = vmatpush.bf16.msrb.mxu2 %v1884_v40  ;;  %481 = vmatpush.bf16.msrb.mxu3 %v1948_v41 }
  0x44   :  { %443 = vmatpush.bf16.msrb.mxu0 %v1872_v47  ;;  %456 = vmatpush.bf16.msrb.mxu1 %v1936_v53 }
  0x45   :  { %469 = vmatpush.bf16.msrb.mxu2 %v1876_v56  ;;  %482 = vmatpush.bf16.msrb.mxu3 %v1940_v59 }
  0x48   :  { %494 = vmatpush.bf16.msra.mxu0 %v3136_v19  ;;  %507 = vmatpush.bf16.msra.mxu1 %v3138_v20  ;;  %v3226_v19 = vld [vmem:[#allocation7] sm:$0xf] }
  0x49   :  { %520 = vmatpush.bf16.msra.mxu2 %v3144_v30  ;;  %533 = vmatpush.bf16.msra.mxu3 %v3146_v31  ;;  %v141_v20 = vperm.slane %v3226_v19, 0  ;;  %v142_v30 = vperm.slane %v3226_v19, 1 }
  0x4c   :  { %495 = vmatpush.bf16.msra.mxu0 %v3150_v36  ;;  %508 = vmatpush.bf16.msra.mxu1 %v3152_v37 }
  0x4d   :  { %521 = vmatpush.bf16.msra.mxu2 %v3158_v42  ;;  %534 = vmatpush.bf16.msra.mxu3 %v3160_v43 }
  0x50   :  { %496 = vmatpush.bf16.msra.mxu0 %v3166_v48  ;;  %509 = vmatpush.bf16.msra.mxu1 %v3168_v49  ;;  %v2055_v49 = vld [vmem:[#allocation10 + $0x70] sm:$0xf] }
  0x51   :  { %522 = vmatpush.bf16.msra.mxu2 %v3172_v54  ;;  %535 = vmatpush.bf16.msra.mxu3 %v3174_v55  ;;  %v2684_v54 = vld [vmem:[#allocation10 + $0x74] sm:$0xf0]  ;;  %v2683_v55 = vld [vmem:[#allocation10 + $0x74] sm:$0xf] }
  0x52   :  { %v2056_v1 = vor.u32 %v2684_v54, %v2055_v49  ;;  %v2015_v54 = vld [vmem:[#allocation10 + $0x20] sm:$0xf] }
  0x54   :  { %497 = vmatpush.bf16.msra.mxu0 %v3178_v60  ;;  %510 = vmatpush.bf16.msra.mxu1 %v3180_v61  ;;  %v2057_v60 = vld [vmem:[#allocation10 + $0x78] sm:$0xf0] }
  0x55   :  { %523 = vmatpush.bf16.msra.mxu2 %v3184_v2  ;;  %536 = vmatpush.bf16.msra.mxu3 %v3186_v3  ;;  %v2060_v2 = vor.u32 %v2683_v55, %v2057_v60  ;;  %v2674_v55 = vld [vmem:[#allocation10 + $0x24] sm:$0xf0]  ;;  %v2673_v60 = vld [vmem:[#allocation10 + $0x24] sm:$0xf] }
  0x58   :  { %498 = vmatpush.bf16.msra.mxu0 %v3190_v8  ;;  %511 = vmatpush.bf16.msra.mxu1 %v3192_v9  ;;  %v2047_v9 = vld [vmem:[#allocation10 + $0x60] sm:$0xf] }
  0x59   :  { %524 = vmatpush.bf16.msra.mxu2 %v3196_v14  ;;  %537 = vmatpush.bf16.msra.mxu3 %v3198_v15  ;;  %v2048_v12 = vor.u32 %v2682_v10, %v2047_v9  ;;  %v2052_v14 = vor.u32 %v2681_v11, %v2049_v13  ;;  %v2119_v15 = vld [vmem:[#allocation10 + $0xf0] sm:$0xf]  ;;  %v2672_v9 = vld [vmem:[#allocation10 + $0x14] sm:$0xf0]  ;;  %v2671_v10 = vld [vmem:[#allocation10 + $0x14] sm:$0xf] }
  0x5a   :  { %v2120_v18 = vor.u32 %v2700_v16, %v2119_v15  ;;  %v2079_v13 = vld [vmem:[#allocation10 + $0xa0] sm:$0xf] }
  0x5c   :  { %499 = vmatpush.bf16.msra.mxu0 %v1888_v22  ;;  %512 = vmatpush.bf16.msra.mxu1 %v3202_v23  ;;  %v2124_v22 = vor.u32 %v2699_v17, %v2121_v21  ;;  %v2039_v23 = vld [vmem:[#allocation10 + $0x50] sm:$0xf]  ;;  %v2689_v17 = vld [vmem:[#allocation10 + $0xa4] sm:$0xf]  ;;  %v1999_v21 = vld [vmem:[#allocation10] sm:$0xf] }
  0x5d   :  { %525 = vmatpush.bf16.msra.mxu2 %v1892_v24  ;;  %538 = vmatpush.bf16.msra.mxu3 %v1956_v25  ;;  %v2680_v24 = vld [vmem:[#allocation10 + $0x54] sm:$0xf0]  ;;  %v2679_v25 = vld [vmem:[#allocation10 + $0x54] sm:$0xf] }
  0x5e   :  { %v2040_v26 = vor.u32 %v2680_v24, %v2039_v23  ;;  %v2670_v23 = vld [vmem:[#allocation10 + $0x4] sm:$0xf0]  ;;  %v2669_v24 = vld [vmem:[#allocation10 + $0x4] sm:$0xf] }
  0x60   :  { %500 = vmatpush.bf16.msra.mxu0 %v1880_v28  ;;  %513 = vmatpush.bf16.msra.mxu1 %v1944_v34  ;;  %v2044_v28 = vor.u32 %v2679_v25, %v2041_v27  ;;  %v2112_v34 = vor.u32 %v2698_v32, %v2111_v29  ;;  %v2001_v25 = vld [vmem:[#allocation10 + $0x8] sm:$0xf0]  ;;  %v2688_v29 = vld [vmem:[#allocation10 + $0x94] sm:$0xf0]  ;;  %v2687_v32 = vld [vmem:[#allocation10 + $0x94] sm:$0xf] }
  0x61   :  { %526 = vmatpush.bf16.msra.mxu2 %v1884_v40  ;;  %539 = vmatpush.bf16.msra.mxu3 %v1948_v41  ;;  %v2678_v40 = vld [vmem:[#allocation10 + $0x44] sm:$0xf0]  ;;  %v2004_v27 = vor.u32 %v2669_v24, %v2001_v25  ;;  %v2759_v24 = vld [vmem:[#allocation13 + $0x1cc] sm:$0xf0] }
  0x62   :  { %v2032_v41 = vor.u32 %v2678_v40, %v2031_v39  ;;  %v2063_v39 = vld [vmem:[#allocation10 + $0x80] sm:$0xf]  ;;  %v2686_v40 = vld [vmem:[#allocation10 + $0x84] sm:$0xf0] }
  0x63   :  { %v2064_v44 = vor.u32 %v2686_v40, %v2063_v39  ;;  %v2783_v39 = vld [vmem:[#allocation13 + $0x28c] sm:$0xf0] }
  0x64   :  { %501 = vmatpush.bf16.msra.mxu0 %v1872_v47  ;;  %514 = vmatpush.bf16.msra.mxu1 %v1936_v53  ;;  %v2103_v47 = vld [vmem:[#allocation10 + $0xd0] sm:$0xf]  ;;  %v2105_v53 = vld [vmem:[#allocation10 + $0xd8] sm:$0xf0] }
  0x65   :  { %527 = vmatpush.bf16.msra.mxu2 %v1876_v56  ;;  %540 = vmatpush.bf16.msra.mxu3 %v1940_v59  ;;  %v2104_v52 = vor.u32 %v2696_v50, %v2103_v47  ;;  %v2108_v56 = vor.u32 %v2695_v51, %v2105_v53  ;;  %v2675_v59 = vld [vmem:[#allocation10 + $0x34] sm:$0xf] }
  0xa4   :  { %v185_v31 = vpop.f32.mrf.mxu0  ;;  %v198_v36 = vpop.f32.mrf.mxu1 }
  0xa5   :  { %v186_v37 = vadd.f32 %v185_v31, %v141_v20  ;;  %v199_v42 = vadd.f32 %v198_v36, %v142_v30  ;;  %v2024_v20 = vor.u32 %v2676_v58, %v2023_v57  ;;  %v2025_v30 = vld [vmem:[#allocation10 + $0x38] sm:$0xf0]  ;;  %v2095_v36 = vld [vmem:[#allocation10 + $0xc0] sm:$0xf] }
  0xa6   :  { %v2028_v31 = vor.u32 %v2675_v59, %v2025_v30  ;;  %v2239_v58 = vld [vmem:[#allocation13 + $0xe0] sm:$0xf]  ;;  %v2731_v59 = vld [vmem:[#allocation13 + $0xec] sm:$0xf0] }
  0xa7   :  { %v228_v43 = vmul.f32 0.01, %v186_v37  ;;  %v229_v48 = vmul.f32 0.01, %v199_v42 }
  0xa9   :  { %v232_v61 = vmax.f32 %v186_v37, %v228_v43  ;;  %v233_v62 = vmax.f32 %v199_v42, %v229_v48  ;;  %v2694_v37 = vld [vmem:[#allocation10 + $0xc4] sm:$0xf0]  ;;  %v2693_v42 = vld [vmem:[#allocation10 + $0xc4] sm:$0xf]  ;;  %v2097_v48 = vld [vmem:[#allocation10 + $0xc8] sm:$0xf0] }
  0xaa   :  { %v2096_v43 = vor.u32 %v2694_v37, %v2095_v36  ;;  %v2100_v49 = vor.u32 %v2693_v42, %v2097_v48  ;;  %v2495_v37 = vld [vmem:[#allocation13 + $0x2e0] sm:$0xf] }
  0xab   :  { %v269_v63 = vpack.c.bf16 %v232_v61, %v232_v61  ;;  %v270_v0 = vpack.c.bf16 %v233_v62, %v233_v62  ;;  %v2016_v61 = vor.u32 %v2674_v55, %v2015_v54  ;;  %v2017_v62 = vld [vmem:[#allocation10 + $0x28] sm:$0xf0]  ;;  %v2795_v54 = vld [vmem:[#allocation13 + $0x2ec] sm:$0xf0] }
  0xac   :  { %v187_v3 = vpop.f32.mrf.mxu0  ;;  %v200_v4 = vpop.f32.mrf.mxu1 }
  0xad   :  { %444 = vmatmul.bf16.vlgmr.msrb.gmra.mxu0 %v269_v63  ;;  %457 = vmatmul.bf16.vlgmr.msrb.gmra.mxu1 %v270_v0  ;;  %v3232_v5 = vpop.f32.mrf.mxu2  ;;  %v3234_v6 = vpop.f32.mrf.mxu3  ;;  %v2089_v4 = vld [vmem:[#allocation10 + $0xb8] sm:$0xf0] }
  0xae   :  { %470 = vmatmul.bf16.vlgmr.msrb.gmra.mxu2 %v269_v63  ;;  %483 = vmatmul.bf16.vlgmr.msrb.gmra.mxu3 %v270_v0  ;;  %v2020_v63 = vor.u32 %v2673_v60, %v2017_v62  ;;  %v2087_v0 = vld [vmem:[#allocation10 + $0xb0] sm:$0xf]  ;;  %v2223_v60 = vld [vmem:[#allocation13 + $0xc0] sm:$0xf]  ;;  %v2496_v62 = vor.u32 %v2795_v54, %v2495_v37 }
  0xaf   :  { %750 = vmatpush.bf16.msrb.mxu0 %v2056_v1  ;;  %776 = vmatpush.bf16.msrb.mxu2 %v2060_v2  ;;  %v2692_v1 = vld [vmem:[#allocation10 + $0xb4] sm:$0xf0]  ;;  %v2691_v2 = vld [vmem:[#allocation10 + $0xb4] sm:$0xf] }
  0xb0   :  { %763 = vmatpush.bf16.msrb.mxu1 %v2120_v18  ;;  %789 = vmatpush.bf16.msrb.mxu3 %v2124_v22  ;;  %v2088_v3 = vor.u32 %v2692_v1, %v2087_v0  ;;  %v2081_v18 = vld [vmem:[#allocation10 + $0xa8] sm:$0xf0]  ;;  %v2791_v1 = vld [vmem:[#allocation13 + $0x2cc] sm:$0xf0] }
  0xb1   :  { %v2084_v22 = vor.u32 %v2689_v17, %v2081_v18  ;;  %v2751_v37 = vld [vmem:[#allocation13 + $0x18c] sm:$0xf0] }
  0xb3   :  { %751 = vmatpush.bf16.msrb.mxu0 %v2048_v12  ;;  %777 = vmatpush.bf16.msrb.mxu2 %v2052_v14  ;;  %v2009_v12 = vld [vmem:[#allocation10 + $0x18] sm:$0xf0]  ;;  %v2690_v14 = vld [vmem:[#allocation10 + $0xa4] sm:$0xf0] }
  0xb4   :  { %764 = vmatpush.bf16.msrb.mxu1 %v2112_v34  ;;  %790 = vmatpush.bf16.msrb.mxu3 %v2116_v38  ;;  %v2012_v15 = vor.u32 %v2671_v10, %v2009_v12  ;;  %v2080_v16 = vor.u32 %v2690_v14, %v2079_v13  ;;  %v2073_v34 = vld [vmem:[#allocation10 + $0x98] sm:$0xf0]  ;;  %v3239_v38 = vld [vmem:[%s3289_s4] sm:$0x3]  ;;  %v2827_v12 = vld [vmem:[#allocation13 + $0x3ec] sm:$0xf0] }
  0xb5   :  { %v213_v7 = vpop.f32.mrf.mxu2  ;;  %v226_v8 = vpop.f32.mrf.mxu3  ;;  %v2076_v35 = vor.u32 %v2687_v32, %v2073_v34  ;;  %v2723_v13 = vld [vmem:[#allocation13 + $0xac] sm:$0xf0]  ;;  %v2463_v14 = vld [vmem:[#allocation13 + $0x2a0] sm:$0xf] }
  0xb6   :  { %v2092_v7 = vor.u32 %v2691_v2, %v2089_v4  ;;  %v2007_v8 = vld [vmem:[#allocation10 + $0x10] sm:$0xf]  ;;  %v2607_v32 = vld [vmem:[#allocation13 + $0x3c0] sm:$0xf] }
  0xb7   :  { %752 = vmatpush.bf16.msrb.mxu0 %v2040_v26  ;;  %778 = vmatpush.bf16.msrb.mxu2 %v2044_v28  ;;  %v2008_v11 = vor.u32 %v2672_v9, %v2007_v8  ;;  %v2000_v26 = vor.u32 %v2670_v23, %v1999_v21  ;;  %v2071_v28 = vld [vmem:[#allocation10 + $0x90] sm:$0xf]  ;;  %v2351_v23 = vld [vmem:[#allocation13 + $0x1c0] sm:$0xf] }
  0xb8   :  { %765 = vmatpush.bf16.msrb.mxu1 %v2104_v52  ;;  %791 = vmatpush.bf16.msrb.mxu3 %v2108_v56  ;;  %v2072_v33 = vor.u32 %v2688_v29, %v2071_v28  ;;  %v273_v56 = vperm.slane %v3239_v38, 1  ;;  %v2763_v4 = vld [vmem:[#allocation13 + $0x1ec] sm:$0xf0]  ;;  %v2191_v28 = vld [vmem:[#allocation13 + $0x80] sm:$0xf] }
  0xb9   :  { %v2719_v34 = vld [vmem:[#allocation13 + $0x8c] sm:$0xf0] }
  0xbb   :  { %753 = vmatpush.bf16.msrb.mxu0 %v2032_v41  ;;  %779 = vmatpush.bf16.msrb.mxu2 %v2036_v46  ;;  %v2685_v41 = vld [vmem:[#allocation10 + $0x84] sm:$0xf]  ;;  %v272_v46 = vperm.slane %v3239_v38, 0 }
  0xbc   :  { %766 = vmatpush.bf16.msrb.mxu1 %v2096_v43  ;;  %792 = vmatpush.bf16.msrb.mxu3 %v2100_v49  ;;  %v2068_v47 = vor.u32 %v2685_v41, %v2065_v45  ;;  %v2240_v49 = vor.u32 %v2731_v59, %v2239_v58  ;;  %v2335_v45 = vld [vmem:[#allocation13 + $0x1a0] sm:$0xf]  ;;  %v2819_v58 = vld [vmem:[#allocation13 + $0x3ac] sm:$0xf0] }
  0xbd   :  { %v2431_v59 = vld [vmem:[#allocation13 + $0x260] sm:$0xf] }
  0xbf   :  { %754 = vmatpush.bf16.msrb.mxu0 %v2024_v20  ;;  %780 = vmatpush.bf16.msrb.mxu2 %v2028_v31  ;;  %v143_v20 = vperm.slane %v3226_v19, 2 }
  0xc0   :  { %767 = vmatpush.bf16.msrb.mxu1 %v2088_v3  ;;  %793 = vmatpush.bf16.msrb.mxu3 %v2092_v7  ;;  %v2367_v3 = vld [vmem:[#allocation13 + $0x1e0] sm:$0xf] }
  0xc1   :  { %v212_v2 = vadd.f32 %v3232_v5, %v143_v20  ;;  %v2207_v7 = vld [vmem:[#allocation13 + $0xa0] sm:$0xf]  ;;  %v2779_v20 = vld [vmem:[#allocation13 + $0x26c] sm:$0xf0] }
  0xc2   :  { %v2432_v54 = vor.u32 %v2779_v20, %v2431_v59  ;;  %v2757_v59 = vld [vmem:[#allocation13 + $0x1c4] sm:$0xf]  ;;  %v2353_v20 = vld [vmem:[#allocation13 + $0x1d0] sm:$0xf0] }
  0xc3   :  { %755 = vmatpush.bf16.msrb.mxu0 %v2016_v61  ;;  %781 = vmatpush.bf16.msrb.mxu2 %v2020_v63  ;;  %v2727_v61 = vld [vmem:[#allocation13 + $0xcc] sm:$0xf0]  ;;  %v2479_v63 = vld [vmem:[#allocation13 + $0x2c0] sm:$0xf]  ;;  %v230_v18 = vmul.f32 0.01, %v212_v2 }
  0xc4   :  { %768 = vmatpush.bf16.msrb.mxu1 %v2080_v16  ;;  %794 = vmatpush.bf16.msrb.mxu3 %v2084_v22  ;;  %v2224_v9 = vor.u32 %v2727_v61, %v2223_v60  ;;  %v2480_v10 = vor.u32 %v2791_v1, %v2479_v63  ;;  %v144_v16 = vperm.slane %v3226_v19, 3  ;;  %v2368_v22 = vor.u32 %v2763_v4, %v2367_v3  ;;  %v2815_v60 = vld [vmem:[#allocation13 + $0x38c] sm:$0xf0]  ;;  %v2415_v61 = vld [vmem:[#allocation13 + $0x240] sm:$0xf] }
  0xc5   :  { %v2352_v19 = vor.u32 %v2759_v24, %v2351_v23  ;;  %v2747_v3 = vld [vmem:[#allocation13 + $0x16c] sm:$0xf0]  ;;  %v2143_v4 = vld [vmem:[#allocation13 + $0x20] sm:$0xf] }
  0xc6   :  { %v225_v41 = vadd.f32 %v3234_v6, %v144_v16  ;;  %v2319_v6 = vld [vmem:[#allocation13 + $0x180] sm:$0xf] }
  0xc7   :  { %756 = vmatpush.bf16.msrb.mxu0 %v2008_v11  ;;  %782 = vmatpush.bf16.msrb.mxu2 %v2012_v15  ;;  %v2623_v11 = vld [vmem:[#allocation13 + $0x3e0] sm:$0xf]  ;;  %v2787_v15 = vld [vmem:[#allocation13 + $0x2ac] sm:$0xf0] }
  0xc8   :  { %769 = vmatpush.bf16.msrb.mxu1 %v2072_v33  ;;  %795 = vmatpush.bf16.msrb.mxu3 %v2076_v35  ;;  %v2624_v25 = vor.u32 %v2827_v12, %v2623_v11  ;;  %v2464_v29 = vor.u32 %v2787_v15, %v2463_v14  ;;  %v2823_v33 = vld [vmem:[#allocation13 + $0x3cc] sm:$0xf0]  ;;  %v2447_v35 = vld [vmem:[#allocation13 + $0x280] sm:$0xf] }
  0xc9   :  { %v2608_v40 = vor.u32 %v2823_v33, %v2607_v32  ;;  %v2811_v11 = vld [vmem:[#allocation13 + $0x36c] sm:$0xf0]  ;;  %v2399_v12 = vld [vmem:[#allocation13 + $0x220] sm:$0xf] }
  0xca   :  { %v2271_v33 = vld [vmem:[#allocation13 + $0x120] sm:$0xf] }
  0xcb   :  { %757 = vmatpush.bf16.msrb.mxu0 %v2000_v26  ;;  %783 = vmatpush.bf16.msrb.mxu2 %v2004_v27  ;;  %v2208_v27 = vor.u32 %v2723_v13, %v2207_v7  ;;  %v2707_v7 = vld [vmem:[#allocation13 + $0x2c] sm:$0xf0] }
  0xcc   :  { %770 = vmatpush.bf16.msrb.mxu1 %v2064_v44  ;;  %796 = vmatpush.bf16.msrb.mxu3 %v2068_v47  ;;  %v2192_v44 = vor.u32 %v2719_v34, %v2191_v28  ;;  %v2755_v47 = vld [vmem:[#allocation13 + $0x1ac] sm:$0xf0]  ;;  %v2144_v16 = vor.u32 %v2707_v7, %v2143_v4  ;;  %v2749_v4 = vld [vmem:[#allocation13 + $0x184] sm:$0xf]  ;;  %v2321_v7 = vld [vmem:[#allocation13 + $0x190] sm:$0xf0] }
  0xcd   :  { %v2771_v13 = vld [vmem:[#allocation13 + $0x22c] sm:$0xf0] }
  0xce   :  { %v2400_v24 = vor.u32 %v2771_v13, %v2399_v12  ;;  %v2739_v34 = vld [vmem:[#allocation13 + $0x12c] sm:$0xf0]  ;;  %v2481_v13 = vld [vmem:[#allocation13 + $0x2d0] sm:$0xf0] }
 0x12a   :  { %v445_v50 = vpop.f32.mrf.mxu0  ;;  %v458_v51 = vpop.f32.mrf.mxu1 }
 0x12b   :  { %v446_v52 = vadd.f32 %v445_v50, %v272_v46  ;;  %v2448_v50 = vor.u32 %v2783_v39, %v2447_v35  ;;  %v2725_v39 = vld [vmem:[#allocation13 + $0xc4] sm:$0xf] }
 0x12d   :  { %v459_v53 = vadd.f32 %v458_v51, %v446_v52  ;;  %v234_v51 = vmax.f32 %v212_v2, %v230_v18  ;;  %v2175_v52 = vld [vmem:[#allocation13 + $0x60] sm:$0xf]  ;;  %v2743_v18 = vld [vmem:[#allocation13 + $0x14c] sm:$0xf0] }
 0x12e   :  { %v2303_v2 = vld [vmem:[#allocation13 + $0x160] sm:$0xf] }
 0x12f   :  { %v488_v57 = vmul.f32 0.01, %v459_v53  ;;  %v2304_v15 = vor.u32 %v2747_v3, %v2303_v2 }
 0x131   :  { %v490_v30 = vmax.f32 %v459_v53, %v488_v57  ;;  %v471_v31 = vpop.f32.mrf.mxu2  ;;  %v484_v36 = vpop.f32.mrf.mxu3  ;;  %v2715_v53 = vld [vmem:[#allocation13 + $0x6c] sm:$0xf0]  ;;  %v2591_v57 = vld [vmem:[#allocation13 + $0x3a0] sm:$0xf] }
 0x132   :  { %v472_v42 = vadd.f32 %v471_v31, %v273_v56  ;;  %v447_v43 = vpop.f32.mrf.mxu0  ;;  %v460_v48 = vpop.f32.mrf.mxu1  ;;  %v2336_v31 = vor.u32 %v2755_v47, %v2335_v45  ;;  %v2735_v45 = vld [vmem:[#allocation13 + $0x10c] sm:$0xf0]  ;;  %v2761_v47 = vld [vmem:[#allocation13 + $0x1e4] sm:$0xf] }
 0x133   :  { %v492_v55 = vpack.c.bf16 %v490_v30, %v490_v30  ;;  %v231_v30 = vmul.f32 0.01, %v225_v41  ;;  %v2159_v43 = vld [vmem:[#allocation13 + $0x40] sm:$0xf]  ;;  %v2711_v48 = vld [vmem:[#allocation13 + $0x4c] sm:$0xf0] }
 0x134   :  { %v485_v0 = vadd.f32 %v484_v36, %v472_v42  ;;  %v2176_v36 = vor.u32 %v2715_v53, %v2175_v52  ;;  %v583_v42 = vpack.c.bf16 %v234_v51, %v234_v51  ;;  %v2160_v1 = vor.u32 %v2711_v48, %v2159_v43  ;;  %v2721_v51 = vld [vmem:[#allocation13 + $0xa4] sm:$0xf]  ;;  %v2209_v52 = vld [vmem:[#allocation13 + $0xb0] sm:$0xf0]  ;;  %v2383_v48 = vld [vmem:[#allocation13 + $0x200] sm:$0xf] }
 0x135   :  { %502 = vmatmul.bf16.vlgmr.msra.gmra.mxu0 %v492_v55  ;;  %528 = vmatmul.bf16.vlgmr.msra.gmra.mxu2 %v492_v55  ;;  %v2575_v55 = vld [vmem:[#allocation13 + $0x380] sm:$0xf]  ;;  %v235_v63 = vmax.f32 %v225_v41, %v231_v30  ;;  %v2717_v30 = vld [vmem:[#allocation13 + $0x84] sm:$0xf] }
 0x136   :  { %v489_v8 = vmul.f32 0.01, %v485_v0  ;;  %1588 = vmatpush.bf16.msra.mxu0 %v2240_v49  ;;  %1614 = vmatpush.bf16.msra.mxu2 %v2496_v62  ;;  %v2592_v49 = vor.u32 %v2819_v58, %v2591_v57  ;;  %v2775_v62 = vld [vmem:[#allocation13 + $0x24c] sm:$0xf0]  ;;  %v2212_v58 = vor.u32 %v2721_v51, %v2209_v52  ;;  %v2737_v52 = vld [vmem:[#allocation13 + $0x124] sm:$0xf] }
 0x137   :  { %v584_v14 = vpack.c.bf16 %v235_v63, %v235_v63  ;;  %v2497_v63 = vld [vmem:[#allocation13 + $0x2f0] sm:$0xf0] }
 0x138   :  { %v491_v17 = vmax.f32 %v485_v0, %v489_v8  ;;  %v2320_v0 = vor.u32 %v2751_v37, %v2319_v6  ;;  %v2576_v8 = vor.u32 %v2815_v60, %v2575_v55  ;;  %v2753_v37 = vld [vmem:[#allocation13 + $0x1a4] sm:$0xf]  ;;  %v2177_v60 = vld [vmem:[#allocation13 + $0x70] sm:$0xf0] }
 0x139   :  { %v473_v5 = vpop.f32.mrf.mxu2  ;;  %v486_v21 = vpop.f32.mrf.mxu3  ;;  %v2713_v55 = vld [vmem:[#allocation13 + $0x64] sm:$0xf] }
 0x13a   :  { %v493_v26 = vpack.c.bf16 %v491_v17, %v491_v17  ;;  %1589 = vmatpush.bf16.msra.mxu0 %v2224_v9  ;;  %1615 = vmatpush.bf16.msra.mxu2 %v2480_v10  ;;  %v2416_v9 = vor.u32 %v2775_v62, %v2415_v61  ;;  %v2559_v10 = vld [vmem:[#allocation13 + $0x360] sm:$0xf]  ;;  %v2703_v21 = vld [vmem:[#allocation13 + $0xc] sm:$0xf0]  ;;  %v2793_v61 = vld [vmem:[#allocation13 + $0x2e4] sm:$0xf]  ;;  %v2180_v62 = vor.u32 %v2713_v55, %v2177_v60 }
 0x13b   :  { %v2287_v17 = vld [vmem:[#allocation13 + $0x140] sm:$0xf]  ;;  %v2560_v23 = vor.u32 %v2811_v11, %v2559_v10  ;;  %v2500_v2 = vor.u32 %v2793_v61, %v2497_v63  ;;  %v2161_v10 = vld [vmem:[#allocation13 + $0x50] sm:$0xf0]  ;;  %v2789_v11 = vld [vmem:[#allocation13 + $0x2c4] sm:$0xf] }
 0x13c   :  { %515 = vmatmul.bf16.vlgmr.msra.gmra.mxu1 %v493_v26  ;;  %541 = vmatmul.bf16.vlgmr.msra.gmra.mxu3 %v493_v26  ;;  %v2127_v5 = vld [vmem:[#allocation13] sm:$0xf]  ;;  %v2288_v28 = vor.u32 %v2743_v18, %v2287_v17  ;;  %v2745_v18 = vld [vmem:[#allocation13 + $0x164] sm:$0xf]  ;;  %v2417_v55 = vld [vmem:[#allocation13 + $0x250] sm:$0xf0] }
 0x13d   :  { %1601 = vmatpush.bf16.msra.mxu1 %v2368_v22  ;;  %1627 = vmatpush.bf16.msra.mxu3 %v2624_v25  ;;  %v2729_v22 = vld [vmem:[#allocation13 + $0xe4] sm:$0xf]  ;;  %v2241_v25 = vld [vmem:[#allocation13 + $0xf0] sm:$0xf0]  ;;  %v2543_v26 = vld [vmem:[#allocation13 + $0x340] sm:$0xf] }
 0x13e   :  { %1590 = vmatpush.bf16.msra.mxu0 %v2208_v27  ;;  %1616 = vmatpush.bf16.msra.mxu2 %v2464_v29  ;;  %v2807_v27 = vld [vmem:[#allocation13 + $0x34c] sm:$0xf0]  ;;  %v2128_v29 = vor.u32 %v2703_v21, %v2127_v5  ;;  %v2244_v32 = vor.u32 %v2729_v22, %v2241_v25  ;;  %v2305_v5 = vld [vmem:[#allocation13 + $0x170] sm:$0xf0]  ;;  %v2825_v21 = vld [vmem:[#allocation13 + $0x3e4] sm:$0xf] }
 0x13f   :  { %v2544_v35 = vor.u32 %v2807_v27, %v2543_v26  ;;  %v2308_v22 = vor.u32 %v2745_v18, %v2305_v5  ;;  %v2705_v25 = vld [vmem:[#allocation13 + $0x24] sm:$0xf]  ;;  %v2145_v26 = vld [vmem:[#allocation13 + $0x30] sm:$0xf0] }
 0x140   :  { %v2785_v27 = vld [vmem:[#allocation13 + $0x2a4] sm:$0xf] }
 0x141   :  { %1602 = vmatpush.bf16.msra.mxu1 %v2352_v19  ;;  %1628 = vmatpush.bf16.msra.mxu3 %v2608_v40  ;;  %v2225_v19 = vld [vmem:[#allocation13 + $0xd0] sm:$0xf0]  ;;  %v2272_v40 = vor.u32 %v2739_v34, %v2271_v33  ;;  %v2741_v33 = vld [vmem:[#allocation13 + $0x144] sm:$0xf] }
 0x142   :  { %1591 = vmatpush.bf16.msra.mxu0 %v2192_v44  ;;  %1617 = vmatpush.bf16.msra.mxu2 %v2448_v50  ;;  %v2228_v41 = vor.u32 %v2725_v39, %v2225_v19  ;;  %v2255_v44 = vld [vmem:[#allocation13 + $0x100] sm:$0xf]  ;;  %v2369_v50 = vld [vmem:[#allocation13 + $0x1f0] sm:$0xf0]  ;;  %v2809_v61 = vld [vmem:[#allocation13 + $0x364] sm:$0xf] }
 0x143   :  { %v2256_v53 = vor.u32 %v2735_v45, %v2255_v44  ;;  %v2372_v57 = vor.u32 %v2761_v47, %v2369_v50  ;;  %v2289_v34 = vld [vmem:[#allocation13 + $0x150] sm:$0xf0]  ;;  %v2781_v45 = vld [vmem:[#allocation13 + $0x284] sm:$0xf] }
 0x144   :  { %v2292_v39 = vor.u32 %v2741_v33, %v2289_v34  ;;  %v2609_v19 = vld [vmem:[#allocation13 + $0x3d0] sm:$0xf0] }
 0x145   :  { %758 = vmatmul.bf16.vlgmr.msrb.gmra.mxu0 %v583_v42  ;;  %784 = vmatmul.bf16.vlgmr.msrb.gmra.mxu2 %v583_v42  ;;  %v2337_v42 = vld [vmem:[#allocation13 + $0x1b0] sm:$0xf0] }
 0x146   :  { %1603 = vmatpush.bf16.msra.mxu1 %v2336_v31  ;;  %1592 = vmatpush.bf16.msra.mxu0 %v2176_v36  ;;  %v2193_v31 = vld [vmem:[#allocation13 + $0x90] sm:$0xf0]  ;;  %v2356_v36 = vor.u32 %v2757_v59, %v2353_v20  ;;  %v2340_v43 = vor.u32 %v2753_v37, %v2337_v42  ;;  %v2813_v42 = vld [vmem:[#allocation13 + $0x384] sm:$0xf] }
 0x147   :  { %1629 = vmatpush.bf16.msra.mxu3 %v2592_v49  ;;  %1618 = vmatpush.bf16.msra.mxu2 %v2432_v54  ;;  %v2196_v6 = vor.u32 %v2717_v30, %v2193_v31  ;;  %v2767_v49 = vld [vmem:[#allocation13 + $0x20c] sm:$0xf0]  ;;  %v2129_v44 = vld [vmem:[#allocation13 + $0x10] sm:$0xf0]  ;;  %v2777_v30 = vld [vmem:[#allocation13 + $0x264] sm:$0xf] }
 0x148   :  { %v2384_v54 = vor.u32 %v2767_v49, %v2383_v48  ;;  %v2449_v50 = vld [vmem:[#allocation13 + $0x290] sm:$0xf0] }
 0x149   :  { %v2452_v51 = vor.u32 %v2781_v45, %v2449_v50  ;;  %v2593_v59 = vld [vmem:[#allocation13 + $0x3b0] sm:$0xf0]  ;;  %v2375_v45 = vld [vmem:[#allocation13 + $0x1e8] sm:$0xf] }
 0x14a   :  { %1604 = vmatpush.bf16.msra.mxu1 %v2320_v0  ;;  %1593 = vmatpush.bf16.msra.mxu0 %v2160_v1  ;;  %v2527_v0 = vld [vmem:[#allocation13 + $0x320] sm:$0xf]  ;;  %v2803_v1 = vld [vmem:[#allocation13 + $0x32c] sm:$0xf0]  ;;  %v2433_v31 = vld [vmem:[#allocation13 + $0x270] sm:$0xf0] }
 0x14b   :  { %1630 = vmatpush.bf16.msra.mxu3 %v2576_v8  ;;  %1619 = vmatpush.bf16.msra.mxu2 %v2416_v9  ;;  %v2528_v3 = vor.u32 %v2803_v1, %v2527_v0  ;;  %v2324_v8 = vor.u32 %v2749_v4, %v2321_v7  ;;  %v2709_v9 = vld [vmem:[#allocation13 + $0x44] sm:$0xf]  ;;  %v2257_v37 = vld [vmem:[#allocation13 + $0x110] sm:$0xf0] }
 0x14c   :  { %771 = vmatmul.bf16.vlgmr.msrb.gmra.mxu1 %v584_v14  ;;  %797 = vmatmul.bf16.vlgmr.msrb.gmra.mxu3 %v584_v14  ;;  %v2164_v12 = vor.u32 %v2709_v9, %v2161_v10  ;;  %v2511_v14 = vld [vmem:[#allocation13 + $0x300] sm:$0xf]  ;;  %v2577_v48 = vld [vmem:[#allocation13 + $0x390] sm:$0xf0]  ;;  %v2769_v0 = vld [vmem:[#allocation13 + $0x224] sm:$0xf] }
 0x14d   :  { %v2580_v49 = vor.u32 %v2813_v42, %v2577_v48  ;;  %v2401_v1 = vld [vmem:[#allocation13 + $0x230] sm:$0xf0] }
 0x14e   :  { %1605 = vmatpush.bf16.msra.mxu1 %v2304_v15  ;;  %1594 = vmatpush.bf16.msra.mxu0 %v2144_v16  ;;  %v2799_v15 = vld [vmem:[#allocation13 + $0x30c] sm:$0xf0]  ;;  %v2484_v16 = vor.u32 %v2789_v11, %v2481_v13  ;;  %v2545_v4 = vld [vmem:[#allocation13 + $0x350] sm:$0xf0]  ;;  %v2801_v11 = vld [vmem:[#allocation13 + $0x324] sm:$0xf] }
 0x14f   :  { %1631 = vmatpush.bf16.msra.mxu3 %v2560_v23  ;;  %1620 = vmatpush.bf16.msra.mxu2 %v2400_v24  ;;  %v2512_v17 = vor.u32 %v2799_v15, %v2511_v14  ;;  %v2625_v23 = vld [vmem:[#allocation13 + $0x3f0] sm:$0xf0]  ;;  %v2797_v15 = vld [vmem:[#allocation13 + $0x304] sm:$0xf] }
 0x150   :  { %v2628_v24 = vor.u32 %v2825_v21, %v2625_v23  ;;  %v2385_v9 = vld [vmem:[#allocation13 + $0x210] sm:$0xf0] }
 0x152   :  { %1606 = vmatpush.bf16.msra.mxu1 %v2288_v28  ;;  %1595 = vmatpush.bf16.msra.mxu0 %v2128_v29  ;;  %v2148_v28 = vor.u32 %v2705_v25, %v2145_v26  ;;  %v2465_v29 = vld [vmem:[#allocation13 + $0x2b0] sm:$0xf0]  ;;  %v2247_v25 = vld [vmem:[#allocation13 + $0xe8] sm:$0xf]  ;;  %v2732_v26 = vld [vmem:[#allocation13 + $0xf4] sm:$0xf0] }
 0x153   :  { %1632 = vmatpush.bf16.msra.mxu3 %v2544_v35  ;;  %1621 = vmatpush.bf16.msra.mxu2 %v2384_v54  ;;  %v2821_v35 = vld [vmem:[#allocation13 + $0x3c4] sm:$0xf] }
 0x154   :  { %v2773_v54 = vld [vmem:[#allocation13 + $0x244] sm:$0xf] }
 0x155   :  { %v2420_v60 = vor.u32 %v2773_v54, %v2417_v55  ;;  %v2343_v55 = vld [vmem:[#allocation13 + $0x1a8] sm:$0xf] }
 0x156   :  { %1640 = vmatpush.bf16.msrb.mxu0 %v2244_v32  ;;  %1607 = vmatpush.bf16.msra.mxu1 %v2272_v40  ;;  %v2468_v32 = vor.u32 %v2785_v27, %v2465_v29  ;;  %v2612_v40 = vor.u32 %v2821_v35, %v2609_v19 }
 0x157   :  { %1666 = vmatpush.bf16.msrb.mxu2 %v2500_v2  ;;  %1633 = vmatpush.bf16.msra.mxu3 %v2528_v3  ;;  %v2404_v2 = vor.u32 %v2769_v0, %v2401_v1  ;;  %v2805_v3 = vld [vmem:[#allocation13 + $0x344] sm:$0xf]  ;;  %v2503_v1 = vld [vmem:[#allocation13 + $0x2e8] sm:$0xf] }
 0x158   :  { %v2548_v7 = vor.u32 %v2805_v3, %v2545_v4 }
 0x15a   :  { %1641 = vmatpush.bf16.msrb.mxu0 %v2228_v41  ;;  %1608 = vmatpush.bf16.msra.mxu1 %v2256_v53  ;;  %v2701_v41 = vld [vmem:[#allocation13 + $0x4] sm:$0xf]  ;;  %v2273_v53 = vld [vmem:[#allocation13 + $0x130] sm:$0xf0] }
 0x15b   :  { %1667 = vmatpush.bf16.msrb.mxu2 %v2484_v16  ;;  %1634 = vmatpush.bf16.msra.mxu3 %v2512_v17  ;;  %v2132_v47 = vor.u32 %v2701_v41, %v2129_v44  ;;  %v2513_v16 = vld [vmem:[#allocation13 + $0x310] sm:$0xf0] }
 0x15c   :  { %v2516_v17 = vor.u32 %v2797_v15, %v2513_v16 }
 0x15e   :  { %1653 = vmatpush.bf16.msrb.mxu1 %v2372_v57  ;;  %1642 = vmatpush.bf16.msrb.mxu0 %v2212_v58  ;;  %v2817_v57 = vld [vmem:[#allocation13 + $0x3a4] sm:$0xf]  ;;  %v2276_v58 = vor.u32 %v2737_v52, %v2273_v53  ;;  %v2724_v52 = vld [vmem:[#allocation13 + $0xb4] sm:$0xf0] }
 0x15f   :  { %1679 = vmatpush.bf16.msrb.mxu3 %v2628_v24  ;;  %1668 = vmatpush.bf16.msrb.mxu2 %v2468_v32  ;;  %v2596_v20 = vor.u32 %v2817_v57, %v2593_v59  ;;  %v2248_v32 = vor.u32 %v2732_v26, %v2247_v25  ;;  %v2760_v59 = vld [vmem:[#allocation13 + $0x1d4] sm:$0xf0]  ;;  %v2631_v26 = vld [vmem:[#allocation13 + $0x3e8] sm:$0xf] }
 0x162   :  { %1654 = vmatpush.bf16.msrb.mxu1 %v2356_v36  ;;  %1643 = vmatpush.bf16.msrb.mxu0 %v2196_v6  ;;  %v2436_v36 = vor.u32 %v2777_v30, %v2433_v31  ;;  %v2733_v6 = vld [vmem:[#allocation13 + $0x104] sm:$0xf] }
 0x163   :  { %1680 = vmatpush.bf16.msrb.mxu3 %v2612_v40  ;;  %1669 = vmatpush.bf16.msrb.mxu2 %v2452_v51  ;;  %v582_v40 = vld [vmem:[#allocation11] sm:$0x3]  ;;  %v2215_v51 = vld [vmem:[#allocation13 + $0xa8] sm:$0xf] }
 0x164   :  { %v2216_v30 = vor.u32 %v2724_v52, %v2215_v51  ;;  %v2135_v52 = vld [vmem:[#allocation13 + $0x8] sm:$0xf] }
 0x166   :  { %1655 = vmatpush.bf16.msrb.mxu1 %v2340_v43  ;;  %1644 = vmatpush.bf16.msrb.mxu0 %v2180_v62  ;;  %v2260_v43 = vor.u32 %v2733_v6, %v2257_v37  ;;  %v2561_v62 = vld [vmem:[#allocation13 + $0x370] sm:$0xf0]  ;;  %v2199_v6 = vld [vmem:[#allocation13 + $0x88] sm:$0xf]  ;;  %v2720_v37 = vld [vmem:[#allocation13 + $0x94] sm:$0xf0] }
 0x167   :  { %1681 = vmatpush.bf16.msrb.mxu3 %v2596_v20  ;;  %1670 = vmatpush.bf16.msrb.mxu2 %v2436_v36  ;;  %v2564_v63 = vor.u32 %v2809_v61, %v2561_v62  ;;  %v2200_v61 = vor.u32 %v2720_v37, %v2199_v6  ;;  %v2183_v62 = vld [vmem:[#allocation13 + $0x68] sm:$0xf]  ;;  %v2740_v37 = vld [vmem:[#allocation13 + $0x134] sm:$0xf0] }
 0x168   :  { %v2279_v6 = vld [vmem:[#allocation13 + $0x128] sm:$0xf] }
 0x16a   :  { %1656 = vmatpush.bf16.msrb.mxu1 %v2324_v8  ;;  %1645 = vmatpush.bf16.msrb.mxu0 %v2164_v12  ;;  %v2765_v8 = vld [vmem:[#allocation13 + $0x204] sm:$0xf]  ;;  %v2529_v12 = vld [vmem:[#allocation13 + $0x330] sm:$0xf0] }
 0x16b   :  { %1682 = vmatpush.bf16.msrb.mxu3 %v2580_v49  ;;  %1671 = vmatpush.bf16.msrb.mxu2 %v2420_v60  ;;  %v2388_v10 = vor.u32 %v2765_v8, %v2385_v9  ;;  %v2532_v14 = vor.u32 %v2801_v11, %v2529_v12  ;;  %v587_v49 = vperm.slane %v582_v40, 1  ;;  %v2756_v60 = vld [vmem:[#allocation13 + $0x1b4] sm:$0xf0]  ;;  %v2327_v8 = vld [vmem:[#allocation13 + $0x188] sm:$0xf] }
 0x16c   :  { %v2344_v3 = vor.u32 %v2756_v60, %v2343_v55  ;;  %v2752_v9 = vld [vmem:[#allocation13 + $0x194] sm:$0xf0]  ;;  %v2439_v55 = vld [vmem:[#allocation13 + $0x268] sm:$0xf] }
 0x16d   :  { %v2780_v60 = vld [vmem:[#allocation13 + $0x274] sm:$0xf0] }
 0x16e   :  { %1657 = vmatpush.bf16.msrb.mxu1 %v2308_v22  ;;  %1646 = vmatpush.bf16.msrb.mxu0 %v2148_v28 }
 0x16f   :  { %1683 = vmatpush.bf16.msrb.mxu3 %v2564_v63  ;;  %1672 = vmatpush.bf16.msrb.mxu2 %v2404_v2  ;;  %v2716_v63 = vld [vmem:[#allocation13 + $0x74] sm:$0xf0] }
 0x170   :  { %v2796_v2 = vld [vmem:[#allocation13 + $0x2f4] sm:$0xf0]  ;;  %v2184_v11 = vor.u32 %v2716_v63, %v2183_v62  ;;  %v2726_v63 = vld [vmem:[#allocation13 + $0xcc] sm:$0xf] }
 0x171   :  { %v2504_v12 = vor.u32 %v2796_v2, %v2503_v1  ;;  %v2263_v1 = vld [vmem:[#allocation13 + $0x108] sm:$0xf]  ;;  %v2736_v2 = vld [vmem:[#allocation13 + $0x114] sm:$0xf0] }
 0x172   :  { %1658 = vmatpush.bf16.msrb.mxu1 %v2292_v39  ;;  %1647 = vmatpush.bf16.msrb.mxu0 %v2132_v47  ;;  %v2231_v39 = vld [vmem:[#allocation13 + $0xc8] sm:$0xf]  ;;  %v2764_v47 = vld [vmem:[#allocation13 + $0x1f4] sm:$0xf0] }
 0x173   :  { %1684 = vmatpush.bf16.msrb.mxu3 %v2548_v7  ;;  %1673 = vmatpush.bf16.msrb.mxu2 %v2388_v10  ;;  %v2376_v53 = vor.u32 %v2764_v47, %v2375_v45  ;;  %v2744_v45 = vld [vmem:[#allocation13 + $0x154] sm:$0xf0]  ;;  %v2615_v47 = vld [vmem:[#allocation13 + $0x3c8] sm:$0xf] }
 0x176   :  { %1659 = vmatpush.bf16.msrb.mxu1 %v2276_v58  ;;  %v2359_v58 = vld [vmem:[#allocation13 + $0x1c8] sm:$0xf] }
 0x177   :  { %1685 = vmatpush.bf16.msrb.mxu3 %v2532_v14 }
 0x17a   :  { %1660 = vmatpush.bf16.msrb.mxu1 %v2260_v43  ;;  %v2360_v43 = vor.u32 %v2760_v59, %v2359_v58  ;;  %v2455_v58 = vld [vmem:[#allocation13 + $0x288] sm:$0xf]  ;;  %v2784_v59 = vld [vmem:[#allocation13 + $0x294] sm:$0xf0] }
 0x17b   :  { %1686 = vmatpush.bf16.msrb.mxu3 %v2516_v17  ;;  %v2712_v17 = vld [vmem:[#allocation13 + $0x54] sm:$0xf0] }
 0x1b2   :  { %v503_v13 = vpop.f32.mrf.mxu0 }
 0x1b3   :  { %v504_v18 = vadd.f32 %v503_v13, %v272_v46  ;;  %v2728_v46 = vld [vmem:[#allocation13 + $0xd4] sm:$0xf0]  ;;  %v2167_v13 = vld [vmem:[#allocation13 + $0x48] sm:$0xf] }
 0x1b4   :  { %v2232_v50 = vor.u32 %v2728_v46, %v2231_v39  ;;  %v2471_v39 = vld [vmem:[#allocation13 + $0x2a8] sm:$0xf]  ;;  %v2788_v46 = vld [vmem:[#allocation13 + $0x2b4] sm:$0xf0] }
 0x1b5   :  { %v2472_v51 = vor.u32 %v2788_v46, %v2471_v39  ;;  %v2808_v39 = vld [vmem:[#allocation13 + $0x354] sm:$0xf0] }
 0x1b8   :  { %v529_v5 = vpop.f32.mrf.mxu2 }
 0x1b9   :  { %v516_v21 = vpop.f32.mrf.mxu1  ;;  %v530_v28 = vadd.f32 %v529_v5, %v273_v56  ;;  %v586_v56 = vperm.slane %v582_v40, 0  ;;  %v2792_v5 = vld [vmem:[#allocation13 + $0x2d4] sm:$0xf0] }
 0x1ba   :  { %v517_v22 = vadd.f32 %v516_v21, %v504_v18  ;;  %v505_v23 = vpop.f32.mrf.mxu0  ;;  %v2487_v18 = vld [vmem:[#allocation13 + $0x2c8] sm:$0xf] }
 0x1bb   :  { %v2311_v23 = vld [vmem:[#allocation13 + $0x168] sm:$0xf] }
 0x1bc   :  { %v546_v24 = vmul.f32 0.01, %v517_v22 }
 0x1be   :  { %v548_v27 = vmax.f32 %v517_v22, %v546_v24  ;;  %v2328_v22 = vor.u32 %v2752_v9, %v2327_v8  ;;  %v2748_v24 = vld [vmem:[#allocation13 + $0x174] sm:$0xf0]  ;;  %v2762_v8 = vld [vmem:[#allocation13 + $0x1ec] sm:$0xf]  ;;  %v2377_v9 = vld [vmem:[#allocation13 + $0x1f8] sm:$0xf0] }
 0x1bf   :  { %v542_v29 = vpop.f32.mrf.mxu3 }
 0x1c0   :  { %v3255_v33 = vpack.c.bf16 %v548_v27, %v548_v27  ;;  %v543_v34 = vadd.f32 %v542_v29, %v530_v28  ;;  %v531_v35 = vpop.f32.mrf.mxu2  ;;  %v2828_v27 = vld [vmem:[#allocation13 + $0x3f4] sm:$0xf0]  ;;  %v2168_v28 = vor.u32 %v2712_v17, %v2167_v13  ;;  %v2488_v29 = vor.u32 %v2792_v5, %v2487_v18  ;;  %v2217_v17 = vld [vmem:[#allocation13 + $0xb8] sm:$0xf0]  ;;  %v2567_v5 = vld [vmem:[#allocation13 + $0x368] sm:$0xf] }
 0x1c1   :  { %v518_v19 = vpop.f32.mrf.mxu1  ;;  %v2708_v35 = vld [vmem:[#allocation13 + $0x34] sm:$0xf0]  ;;  %v2632_v40 = vor.u32 %v2828_v27, %v2631_v26  ;;  %v2264_v13 = vor.u32 %v2736_v2, %v2263_v1  ;;  %v2380_v18 = vor.u32 %v2762_v8, %v2377_v9  ;;  %v2407_v26 = vld [vmem:[#allocation13 + $0x228] sm:$0xf]  ;;  %v2786_v8 = vld [vmem:[#allocation13 + $0x2ac] sm:$0xf] }
 0x1c2   :  { %v547_v41 = vmul.f32 0.01, %v543_v34  ;;  %1596 = vmatmul.bf16.vlgmr.msra.gmra.mxu0 %v3255_v33  ;;  %v759_v44 = vpop.f32.mrf.mxu0  ;;  %v2312_v19 = vor.u32 %v2748_v24, %v2311_v23  ;;  %v2758_v23 = vld [vmem:[#allocation13 + $0x1cc] sm:$0xf]  ;;  %v2361_v24 = vld [vmem:[#allocation13 + $0x1d8] sm:$0xf0] }
 0x1c3   :  { %1692 = vmatpush.bf16.msra.mxu0 %v2248_v32  ;;  %v760_v31 = vadd.f32 %v759_v44, %v586_v56  ;;  %v2151_v32 = vld [vmem:[#allocation13 + $0x28] sm:$0xf]  ;;  %v2772_v27 = vld [vmem:[#allocation13 + $0x234] sm:$0xf0]  ;;  %v2473_v9 = vld [vmem:[#allocation13 + $0x2b8] sm:$0xf0] }
 0x1c4   :  { %v549_v38 = vmax.f32 %v543_v34, %v547_v41  ;;  %v2295_v41 = vld [vmem:[#allocation13 + $0x148] sm:$0xf]  ;;  %v2152_v56 = vor.u32 %v2708_v35, %v2151_v32  ;;  %v2201_v32 = vld [vmem:[#allocation13 + $0x98] sm:$0xf0]  ;;  %v2408_v46 = vor.u32 %v2772_v27, %v2407_v26  ;;  %v2738_v26 = vld [vmem:[#allocation13 + $0x12c] sm:$0xf] }
 0x1c5   :  { %v2551_v35 = vld [vmem:[#allocation13 + $0x348] sm:$0xf]  ;;  %v2281_v27 = vld [vmem:[#allocation13 + $0x138] sm:$0xf0] }
 0x1c6   :  { %v3258_v57 = vpack.c.bf16 %v549_v38, %v549_v38 }
 0x1c7   :  { %1693 = vmatpush.bf16.msra.mxu0 %v2232_v50  ;;  %v544_v20 = vpop.f32.mrf.mxu3  ;;  %v2824_v50 = vld [vmem:[#allocation13 + $0x3d4] sm:$0xf0] }
 0x1c8   :  { %1609 = vmatmul.bf16.vlgmr.msra.gmra.mxu1 %v3258_v57  ;;  %v785_v36 = vpop.f32.mrf.mxu2  ;;  %v2296_v20 = vor.u32 %v2744_v45, %v2295_v41  ;;  %v2391_v45 = vld [vmem:[#allocation13 + $0x208] sm:$0xf] }
 0x1c9   :  { %1705 = vmatpush.bf16.msra.mxu1 %v2376_v53  ;;  %v772_v42 = vpop.f32.mrf.mxu1  ;;  %v786_v7 = vadd.f32 %v785_v36, %v587_v49  ;;  %v2704_v53 = vld [vmem:[#allocation13 + $0x14] sm:$0xf0]  ;;  %v2249_v36 = vld [vmem:[#allocation13 + $0xf8] sm:$0xf0]  ;;  %v2456_v49 = vor.u32 %v2784_v59, %v2455_v58  ;;  %v2535_v58 = vld [vmem:[#allocation13 + $0x328] sm:$0xf] }
 0x1ca   :  { %v773_v48 = vadd.f32 %v772_v42, %v760_v31  ;;  %v761_v54 = vpop.f32.mrf.mxu0  ;;  %v2730_v31 = vld [vmem:[#allocation13 + $0xec] sm:$0xf]  ;;  %v2599_v42 = vld [vmem:[#allocation13 + $0x3a8] sm:$0xf]  ;;  %v2804_v59 = vld [vmem:[#allocation13 + $0x334] sm:$0xf0] }
 0x1cb   :  { %1694 = vmatpush.bf16.msra.mxu0 %v2216_v30  ;;  %v2616_v30 = vor.u32 %v2824_v50, %v2615_v47  ;;  %v2252_v54 = vor.u32 %v2730_v31, %v2249_v36  ;;  %v2768_v47 = vld [vmem:[#allocation13 + $0x214] sm:$0xf0]  ;;  %v2714_v50 = vld [vmem:[#allocation13 + $0x6c] sm:$0xf]  ;;  %v2329_v31 = vld [vmem:[#allocation13 + $0x198] sm:$0xf0] }
 0x1cc   :  { %v802_v0 = vmul.f32 0.01, %v773_v48 }
 0x1cd   :  { %1706 = vmatpush.bf16.msra.mxu1 %v2360_v43  ;;  %v2820_v43 = vld [vmem:[#allocation13 + $0x3b4] sm:$0xf0] }
 0x1ce   :  { %v804_v4 = vmax.f32 %v773_v48, %v802_v0  ;;  %v2136_v48 = vor.u32 %v2704_v53, %v2135_v52  ;;  %v2600_v62 = vor.u32 %v2820_v43, %v2599_v42  ;;  %v2233_v0 = vld [vmem:[#allocation13 + $0xd8] sm:$0xf0]  ;;  %v2536_v42 = vor.u32 %v2804_v59, %v2535_v58 }
 0x1cf   :  { %1695 = vmatpush.bf16.msra.mxu0 %v2200_v61  ;;  %v798_v10 = vpop.f32.mrf.mxu3  ;;  %v2280_v61 = vor.u32 %v2740_v37, %v2279_v6  ;;  %v2505_v52 = vld [vmem:[#allocation13 + $0x2f8] sm:$0xf0]  ;;  %v2710_v37 = vld [vmem:[#allocation13 + $0x4c] sm:$0xf] }
 0x1d0   :  { %v3261_v14 = vpack.c.bf16 %v804_v4, %v804_v4  ;;  %v799_v15 = vadd.f32 %v798_v10, %v786_v7  ;;  %v787_v16 = vpop.f32.mrf.mxu2  ;;  %v2816_v4 = vld [vmem:[#allocation13 + $0x394] sm:$0xf0]  ;;  %v2440_v7 = vor.u32 %v2780_v60, %v2439_v55  ;;  %v2236_v10 = vor.u32 %v2726_v63, %v2233_v0  ;;  %v2169_v43 = vld [vmem:[#allocation13 + $0x58] sm:$0xf0]  ;;  %v2519_v55 = vld [vmem:[#allocation13 + $0x308] sm:$0xf] }
 0x1d1   :  { %1707 = vmatpush.bf16.msra.mxu1 %v2344_v3  ;;  %v774_v21 = vpop.f32.mrf.mxu1  ;;  %v2583_v3 = vld [vmem:[#allocation13 + $0x388] sm:$0xf]  ;;  %v2722_v16 = vld [vmem:[#allocation13 + $0xac] sm:$0xf]  ;;  %v2800_v60 = vld [vmem:[#allocation13 + $0x314] sm:$0xf0]  ;;  %v2172_v1 = vor.u32 %v2710_v37, %v2169_v43 }
 0x1d2   :  { %v803_v25 = vmul.f32 0.01, %v799_v15  ;;  %1622 = vmatmul.bf16.vlgmr.msra.gmra.mxu2 %v3261_v14  ;;  %1648 = vmatmul.bf16.vlgmr.msrb.gmra.mxu0 %v3255_v33  ;;  %v2812_v21 = vld [vmem:[#allocation13 + $0x374] sm:$0xf0]  ;;  %v2826_v63 = vld [vmem:[#allocation13 + $0x3ec] sm:$0xf] }
 0x1d3   :  { %1696 = vmatpush.bf16.msra.mxu0 %v2184_v11  ;;  %1718 = vmatpush.bf16.msra.mxu2 %v2504_v12  ;;  %v2423_v11 = vld [vmem:[#allocation13 + $0x248] sm:$0xf]  ;;  %v2776_v12 = vld [vmem:[#allocation13 + $0x254] sm:$0xf0]  ;;  %v2633_v0 = vld [vmem:[#allocation13 + $0x3f8] sm:$0xf0] }
 0x1d4   :  { %v805_v34 = vmax.f32 %v799_v15, %v803_v25  ;;  %v2584_v15 = vor.u32 %v2816_v4, %v2583_v3  ;;  %v2220_v25 = vor.u32 %v2722_v16, %v2217_v17  ;;  %v2706_v3 = vld [vmem:[#allocation13 + $0x2c] sm:$0xf]  ;;  %v2520_v4 = vor.u32 %v2800_v60, %v2519_v55  ;;  %v2617_v16 = vld [vmem:[#allocation13 + $0x3d8] sm:$0xf0] }
 0x1d5   :  { %1708 = vmatpush.bf16.msra.mxu1 %v2328_v22  ;;  %v2424_v22 = vor.u32 %v2776_v12, %v2423_v11  ;;  %v2636_v11 = vor.u32 %v2826_v63, %v2633_v0  ;;  %v2742_v12 = vld [vmem:[#allocation13 + $0x14c] sm:$0xf]  ;;  %v2569_v58 = vld [vmem:[#allocation13 + $0x378] sm:$0xf0] }
 0x1d6   :  { %v3265_v44 = vpack.c.bf16 %v805_v34, %v805_v34  ;;  %v2364_v34 = vor.u32 %v2758_v23, %v2361_v24  ;;  %v2457_v23 = vld [vmem:[#allocation13 + $0x298] sm:$0xf0]  ;;  %v2798_v60 = vld [vmem:[#allocation13 + $0x30c] sm:$0xf] }
 0x1d7   :  { %1697 = vmatpush.bf16.msra.mxu0 %v2168_v28  ;;  %1719 = vmatpush.bf16.msra.mxu2 %v2488_v29  ;;  %v800_v38 = vpop.f32.mrf.mxu3  ;;  %v2568_v28 = vor.u32 %v2812_v21, %v2567_v5  ;;  %v2718_v29 = vld [vmem:[#allocation13 + $0x8c] sm:$0xf]  ;;  %v2137_v21 = vld [vmem:[#allocation13 + $0x18] sm:$0xf0] }
 0x1d8   :  { %1635 = vmatmul.bf16.vlgmr.msra.gmra.mxu3 %v3265_v44  ;;  %1661 = vmatmul.bf16.vlgmr.msrb.gmra.mxu1 %v3258_v57  ;;  %v2204_v41 = vor.u32 %v2718_v29, %v2201_v32  ;;  %v2552_v38 = vor.u32 %v2808_v39, %v2551_v35  ;;  %v2702_v5 = vld [vmem:[#allocation13 + $0xc] sm:$0xf]  ;;  %v2601_v29 = vld [vmem:[#allocation13 + $0x3b8] sm:$0xf0] }
 0x1d9   :  { %1709 = vmatpush.bf16.msra.mxu1 %v2312_v19  ;;  %1731 = vmatpush.bf16.msra.mxu3 %v2632_v40  ;;  %v2754_v19 = vld [vmem:[#allocation13 + $0x1ac] sm:$0xf]  ;;  %v2345_v40 = vld [vmem:[#allocation13 + $0x1b8] sm:$0xf0]  ;;  %v2140_v32 = vor.u32 %v2702_v5, %v2137_v21 }
 0x1da   :  { %v2348_v53 = vor.u32 %v2754_v19, %v2345_v40  ;;  %v2778_v35 = vld [vmem:[#allocation13 + $0x26c] sm:$0xf]  ;;  %v2441_v39 = vld [vmem:[#allocation13 + $0x278] sm:$0xf0] }
 0x1db   :  { %1698 = vmatpush.bf16.msra.mxu0 %v2152_v56  ;;  %1720 = vmatpush.bf16.msra.mxu2 %v2472_v51  ;;  %v2185_v56 = vld [vmem:[#allocation13 + $0x78] sm:$0xf0]  ;;  %v2794_v51 = vld [vmem:[#allocation13 + $0x2ec] sm:$0xf] }
 0x1dc   :  { %v2188_v36 = vor.u32 %v2714_v50, %v2185_v56  ;;  %v2508_v6 = vor.u32 %v2794_v51, %v2505_v52  ;;  %v2734_v40 = vld [vmem:[#allocation13 + $0x10c] sm:$0xf]  ;;  %v2444_v50 = vor.u32 %v2778_v35, %v2441_v39  ;;  %v2425_v56 = vld [vmem:[#allocation13 + $0x258] sm:$0xf0] }
 0x1dd   :  { %1710 = vmatpush.bf16.msra.mxu1 %v2296_v20  ;;  %1732 = vmatpush.bf16.msra.mxu3 %v2616_v30  ;;  %v2392_v20 = vor.u32 %v2768_v47, %v2391_v45  ;;  %v2750_v30 = vld [vmem:[#allocation13 + $0x18c] sm:$0xf]  ;;  %v2585_v47 = vld [vmem:[#allocation13 + $0x398] sm:$0xf0] }
 0x1de   :  { %v2814_v45 = vld [vmem:[#allocation13 + $0x38c] sm:$0xf]  ;;  %v2393_v43 = vld [vmem:[#allocation13 + $0x218] sm:$0xf0] }
 0x1df   :  { %1699 = vmatpush.bf16.msra.mxu0 %v2136_v48  ;;  %1721 = vmatpush.bf16.msra.mxu2 %v2456_v49  ;;  %v2790_v48 = vld [vmem:[#allocation13 + $0x2cc] sm:$0xf]  ;;  %v2489_v49 = vld [vmem:[#allocation13 + $0x2d8] sm:$0xf0]  ;;  %v2588_v52 = vor.u32 %v2814_v45, %v2585_v47 }
 0x1e0   :  { %v2492_v2 = vor.u32 %v2790_v48, %v2489_v49  ;;  %v2537_v49 = vld [vmem:[#allocation13 + $0x338] sm:$0xf0] }
 0x1e1   :  { %1711 = vmatpush.bf16.msra.mxu1 %v2280_v61  ;;  %1733 = vmatpush.bf16.msra.mxu3 %v2600_v62  ;;  %v2746_v61 = vld [vmem:[#allocation13 + $0x16c] sm:$0xf]  ;;  %v2313_v62 = vld [vmem:[#allocation13 + $0x178] sm:$0xf0] }
 0x1e2   :  { %1674 = vmatmul.bf16.vlgmr.msrb.gmra.mxu2 %v3261_v14  ;;  %1700 = vmatmul.bf16.vlgmr.msra.gmra.mxu0 %v3255_v33 }
 0x1e3   :  { %1744 = vmatpush.bf16.msrb.mxu0 %v2252_v54  ;;  %1722 = vmatpush.bf16.msra.mxu2 %v2440_v7  ;;  %v2332_v54 = vor.u32 %v2750_v30, %v2329_v31  ;;  %v2153_v7 = vld [vmem:[#allocation13 + $0x38] sm:$0xf0] }
 0x1e4   :  { %v2156_v17 = vor.u32 %v2706_v3, %v2153_v7  ;;  %v2409_v30 = vld [vmem:[#allocation13 + $0x238] sm:$0xf0] }
 0x1e5   :  { %1712 = vmatpush.bf16.msra.mxu1 %v2264_v13  ;;  %1734 = vmatpush.bf16.msra.mxu3 %v2584_v15  ;;  %v2297_v13 = vld [vmem:[#allocation13 + $0x158] sm:$0xf0]  ;;  %v2822_v15 = vld [vmem:[#allocation13 + $0x3cc] sm:$0xf] }
 0x1e6   :  { %v2300_v24 = vor.u32 %v2742_v12, %v2297_v13 }
 0x1e7   :  { %1745 = vmatpush.bf16.msrb.mxu0 %v2236_v10  ;;  %1723 = vmatpush.bf16.msra.mxu2 %v2424_v22  ;;  %v2316_v10 = vor.u32 %v2746_v61, %v2313_v62  ;;  %v2782_v22 = vld [vmem:[#allocation13 + $0x28c] sm:$0xf]  ;;  %v2521_v61 = vld [vmem:[#allocation13 + $0x318] sm:$0xf0] }
 0x1e8   :  { %1687 = vmatmul.bf16.vlgmr.msrb.gmra.mxu3 %v3265_v44  ;;  %1713 = vmatmul.bf16.vlgmr.msra.gmra.mxu1 %v3258_v57  ;;  %v2524_v62 = vor.u32 %v2798_v60, %v2521_v61 }
 0x1e9   :  { %1757 = vmatpush.bf16.msrb.mxu1 %v2380_v18  ;;  %1735 = vmatpush.bf16.msra.mxu3 %v2568_v28  ;;  %v2476_v18 = vor.u32 %v2786_v8, %v2473_v9  ;;  %v2818_v28 = vld [vmem:[#allocation13 + $0x3ac] sm:$0xf] }
 0x1ea   :  { %v2604_v19 = vor.u32 %v2818_v28, %v2601_v29 }
 0x1eb   :  { %1746 = vmatpush.bf16.msrb.mxu0 %v2220_v25  ;;  %1724 = vmatpush.bf16.msra.mxu2 %v2408_v46  ;;  %v2620_v25 = vor.u32 %v2822_v15, %v2617_v16  ;;  %v2284_v46 = vor.u32 %v2738_v26, %v2281_v27 }
 0x1ed   :  { %1758 = vmatpush.bf16.msrb.mxu1 %v2364_v34  ;;  %1736 = vmatpush.bf16.msra.mxu3 %v2552_v38  ;;  %v2460_v34 = vor.u32 %v2782_v22, %v2457_v23  ;;  %v2774_v38 = vld [vmem:[#allocation13 + $0x24c] sm:$0xf] }
 0x1ee   :  { %v2428_v59 = vor.u32 %v2774_v38, %v2425_v56 }
 0x1ef   :  { %1747 = vmatpush.bf16.msrb.mxu0 %v2204_v41  ;;  %1725 = vmatpush.bf16.msra.mxu2 %v2392_v20  ;;  %v2265_v41 = vld [vmem:[#allocation13 + $0x118] sm:$0xf0]  ;;  %v2770_v20 = vld [vmem:[#allocation13 + $0x22c] sm:$0xf] }
 0x1f0   :  { %v2268_v51 = vor.u32 %v2734_v40, %v2265_v41  ;;  %v2412_v37 = vor.u32 %v2770_v20, %v2409_v30 }
 0x1f1   :  { %1759 = vmatpush.bf16.msrb.mxu1 %v2348_v53  ;;  %1737 = vmatpush.bf16.msra.mxu3 %v2536_v42  ;;  %v2810_v53 = vld [vmem:[#allocation13 + $0x36c] sm:$0xf] }
 0x1f2   :  { %1726 = vmatmul.bf16.vlgmr.msra.gmra.mxu2 %v3261_v14  ;;  %v2572_v31 = vor.u32 %v2810_v53, %v2569_v58  ;;  %v2766_v42 = vld [vmem:[#allocation13 + $0x20c] sm:$0xf] }
 0x1f3   :  { %1748 = vmatpush.bf16.msrb.mxu0 %v2188_v36  ;;  %1770 = vmatpush.bf16.msrb.mxu2 %v2508_v6  ;;  %v2806_v36 = vld [vmem:[#allocation13 + $0x34c] sm:$0xf]  ;;  %v2553_v6 = vld [vmem:[#allocation13 + $0x358] sm:$0xf0] }
 0x1f4   :  { %v2556_v48 = vor.u32 %v2806_v36, %v2553_v6 }
 0x1f5   :  { %1760 = vmatpush.bf16.msrb.mxu1 %v2332_v54  ;;  %1738 = vmatpush.bf16.msra.mxu3 %v2520_v4  ;;  %v2396_v54 = vor.u32 %v2766_v42, %v2393_v43 }
 0x1f7   :  { %1749 = vmatpush.bf16.msrb.mxu0 %v2172_v1  ;;  %1771 = vmatpush.bf16.msrb.mxu2 %v2492_v2  ;;  %v938_v2 = vld [vmem:[%s3293_s8] sm:$0xf]  ;;  %s3058_s8 = smov [#allocation14]  }
 0x1f8   :  { %1739 = vmatmul.bf16.vlgmr.msra.gmra.mxu3 %v3265_v44  ;;  %v940_v4 = vperm.slane %v938_v2, 0  ;;  %v943_v20 = vperm.slane %v938_v2, 3  ;;  %s1850_s22 = sshll.u32 %s3058_s8, 4  ;;  %s1851_s22 = int_to_ptr.vmem [resolvable:$true] %s1850_s22 }
 0x1f9   :  { %1761 = vmatpush.bf16.msrb.mxu1 %v2316_v10  ;;  %1783 = vmatpush.bf16.msrb.mxu3 %v2636_v11 }
 0x1fb   :  { %1750 = vmatpush.bf16.msrb.mxu0 %v2156_v17  ;;  %1772 = vmatpush.bf16.msrb.mxu2 %v2476_v18  ;;  %v941_v17 = vperm.slane %v938_v2, 1 }
 0x1fd   :  { %1762 = vmatpush.bf16.msrb.mxu1 %v2300_v24  ;;  %1784 = vmatpush.bf16.msrb.mxu3 %v2620_v25 }
 0x1ff   :  { %1751 = vmatpush.bf16.msrb.mxu0 %v2140_v32  ;;  %1773 = vmatpush.bf16.msrb.mxu2 %v2460_v34  ;;  %v942_v32 = vperm.slane %v938_v2, 2 }
 0x201   :  { %1763 = vmatpush.bf16.msrb.mxu1 %v2284_v46  ;;  %1785 = vmatpush.bf16.msrb.mxu3 %v2604_v19 }
 0x202   :  { %1752 = vmatmul.bf16.vlgmr.msrb.gmra.mxu0 %v3255_v33  ;;  %v2802_v33 = vld [vmem:[#allocation13 + $0x32c] sm:$0xf] }
 0x203   :  { %1774 = vmatpush.bf16.msrb.mxu2 %v2444_v50  ;;  %v2540_v55 = vor.u32 %v2802_v33, %v2537_v49 }
 0x205   :  { %1764 = vmatpush.bf16.msrb.mxu1 %v2268_v51  ;;  %1786 = vmatpush.bf16.msrb.mxu3 %v2588_v52 }
 0x207   :  { %1775 = vmatpush.bf16.msrb.mxu2 %v2428_v59 }
 0x208   :  { %1765 = vmatmul.bf16.vlgmr.msrb.gmra.mxu1 %v3258_v57 }
 0x209   :  { %1787 = vmatpush.bf16.msrb.mxu3 %v2572_v31 }
 0x20b   :  { %1776 = vmatpush.bf16.msrb.mxu2 %v2412_v37 }
 0x20d   :  { %1788 = vmatpush.bf16.msrb.mxu3 %v2556_v48 }
 0x20f   :  { %1777 = vmatpush.bf16.msrb.mxu2 %v2396_v54 }
 0x211   :  { %1789 = vmatpush.bf16.msrb.mxu3 %v2540_v55 }
 0x212   :  { %1778 = vmatmul.bf16.vlgmr.msrb.gmra.mxu2 %v3261_v14 }
 0x215   :  { %1790 = vmatpush.bf16.msrb.mxu3 %v2524_v62 }
 0x218   :  { %1791 = vmatmul.bf16.vlgmr.msrb.gmra.mxu3 %v3265_v44 }
 0x23f   :  { %v1597_v57 = vpop.f32.mrf.mxu0 }
 0x240   :  { %v1598_v9 = vadd.f32 %v1597_v57, %v940_v4 }
 0x245   :  { %v1610_v63 = vpop.f32.mrf.mxu1 }
 0x246   :  { %v1611_v11 = vadd.f32 %v1610_v63, %v1598_v9 }
 0x247   :  { %v1599_v0 = vpop.f32.mrf.mxu0 }
 0x24d   :  { %v1612_v1 = vpop.f32.mrf.mxu1 }
 0x24f   :  { %v1649_v3 = vpop.f32.mrf.mxu0 }
 0x250   :  { %v1650_v21 = vadd.f32 %v1649_v3, %v941_v17 }
 0x255   :  { %v1623_v7 = vpop.f32.mrf.mxu2  ;;  %v1662_v8 = vpop.f32.mrf.mxu1 }
 0x256   :  { %v1624_v12 = vadd.f32 %v1623_v7, %v1611_v11  ;;  %v1663_v24 = vadd.f32 %v1662_v8, %v1650_v21 }
 0x257   :  { %v1651_v10 = vpop.f32.mrf.mxu0 }
 0x25b   :  { %v1636_v14 = vpop.f32.mrf.mxu3 }
 0x25c   :  { %v1637_v13 = vadd.f32 %v1636_v14, %v1624_v12 }
 0x25d   :  { %v1625_v15 = vpop.f32.mrf.mxu2  ;;  %v1664_v44 = vpop.f32.mrf.mxu1 }
 0x25e   :  { %1841 = vst [vmem:[#allocation14] sm:$0xff] %v1637_v13 }
 0x25f   :  { %v1701_v16 = vpop.f32.mrf.mxu0 }
 0x260   :  { %v1702_v39 = vadd.f32 %v1701_v16, %v942_v32 }
 0x263   :  { %v1638_v18 = vpop.f32.mrf.mxu3 }
 0x265   :  { %v1675_v5 = vpop.f32.mrf.mxu2  ;;  %v1714_v22 = vpop.f32.mrf.mxu1 }
 0x266   :  { %v1676_v25 = vadd.f32 %v1675_v5, %v1663_v24  ;;  %v1715_v46 = vadd.f32 %v1714_v22, %v1702_v39 }
 0x267   :  { %v1703_v23 = vpop.f32.mrf.mxu0 }
 0x26b   :  { %v1688_v26 = vpop.f32.mrf.mxu3 }
 0x26c   :  { %v1689_v27 = vadd.f32 %v1688_v26, %v1676_v25 }
 0x26d   :  { %v1677_v28 = vpop.f32.mrf.mxu2  ;;  %v1716_v29 = vpop.f32.mrf.mxu1 }
 0x26e   :  { %1842 = vst [vmem:[#allocation14 + $0x8] sm:$0xff] %v1689_v27 }
 0x273   :  { %v1690_v34 = vpop.f32.mrf.mxu3 }
 0x275   :  { %v1727_v35 = vpop.f32.mrf.mxu2 }
 0x276   :  { %v1728_v19 = vadd.f32 %v1727_v35, %v1715_v46 }
 0x27b   :  { %v1740_v40 = vpop.f32.mrf.mxu3 }
 0x27c   :  { %v1741_v45 = vadd.f32 %v1740_v40, %v1728_v19 }
 0x27d   :  { %v1729_v47 = vpop.f32.mrf.mxu2 }
 0x27e   :  { %v1819_v50 = vsub.f32 0.0, %v1741_v45 }
 0x27f   :  { %v1753_v41 = vpop.f32.mrf.mxu0 }
 0x280   :  { %v1825_v38 = vmul.f32 1.442695, %v1819_v50  ;;  %v1754_v36 = vadd.f32 %v1753_v41, %v943_v20 }
 0x282   :  { %2841 = vpow2.f32 %v1825_v38 }
 0x283   :  { %v1742_v51 = vpop.f32.mrf.mxu3 }
 0x285   :  { %v1766_v56 = vpop.f32.mrf.mxu1 }
 0x286   :  { %v1767_v6 = vadd.f32 %v1766_v56, %v1754_v36 }
 0x287   :  { %v1755_v52 = vpop.f32.mrf.mxu0 }
 0x288   :  { %v2842_v53 = vpop.eup %2841 }
 0x289   :  { %v1831_v58 = vadd.f32 1.0, %v2842_v53 }
 0x28b   :  { %2843 = vrcp.f32 %v1831_v58 }
 0x28d   :  { %v1768_v59 = vpop.f32.mrf.mxu1 }
 0x291   :  { %v2844_v30 = vpop.eup %2843 }
 0x292   :  { %1843 = vst [vmem:[#allocation14 + $0x10] sm:$0xff] %v2844_v30 }
 0x295   :  { %v1779_v31 = vpop.f32.mrf.mxu2 }
 0x296   :  { %v1780_v37 = vadd.f32 %v1779_v31, %v1767_v6 }
 0x29b   :  { %v1792_v42 = vpop.f32.mrf.mxu3 }
 0x29c   :  { %v1793_v43 = vadd.f32 %v1792_v42, %v1780_v37 }
 0x29d   :  { %v1781_v48 = vpop.f32.mrf.mxu2 }
 0x29e   :  { %1844 = vst [vmem:[#allocation14 + $0x18] sm:$0xff] %v1793_v43 }
 0x29f   :  { %1855 = dma.vmem_to_hbm [thread:$0]  %s1851_s22, 512, %s1853_s3, [#allocation4]  }
 0x2a3   :  { %v1794_v33 = vpop.f32.mrf.mxu3 }
 0x2a4   :  { %3045 = dma.done.wait [#allocation4], 512  }
 0x2a5   :  { %3046 = vsyncadd [#allocation4], 4294966784 }
 0x2a6   :  { %1860 = vsyncpa [#allocation3], 1 }
 0x2a7   :  { %1861 = vsyncpa [#allocation6], 1 }
 0x2a8   :  { %1862 = vsyncpa [#allocation9], 1 }
 0x2a9   :  { %1863 = vsyncpa [#allocation12], 1 }
 0x2aa   :  { %1864 = vsyncpa [#allocation4], 1 }

</bundles_post_ra>
